<compile_context>
chip_gen: v5e
topology: v5e:2x2
jax: 0.10.0
libtpu: 0.0.40
codegen_flags: <defaults>
</compile_context>

<pallas_src>
import functools

import jax
import jax.numpy as jnp
from jax import lax
from jax.experimental import pallas as pl
from jax.experimental.pallas import tpu as pltpu


def _spatial_attention_kernel(w_ref, x_ref, o_ref, sum_pad_ref, max_pad_ref, *,
                              ksize, C, H, W, nb, c_chunk, lpad, lane_strip):
    # w_ref       : SMEM (2*k*k,) f32   conv weights, avg half pre-scaled by 1/C
    # x_ref       : VMEM (nb, C, HW)    batch block, lane-dense, unpadded
    # o_ref       : VMEM (nb, C, HW)
    # sum_pad_ref : VMEM (nb, lpad+HW+lpad) f32  zero-margined channel-sum map
    # max_pad_ref : VMEM (nb, lpad+HW+lpad) f32  zero-margined channel-max map
    HW = H * W
    pad = ksize // 2
    kk = ksize * ksize
    PHW = lpad + HW + lpad

    # ---- (re)zero only the conv margins; interior is fully rewritten below --
    zeros_m = jnp.zeros((nb, lpad), jnp.float32)
    sum_pad_ref[:, 0:lpad] = zeros_m
    sum_pad_ref[:, lpad + HW:PHW] = zeros_m
    max_pad_ref[:, 0:lpad] = zeros_m
    max_pad_ref[:, lpad + HW:PHW] = zeros_m

    # ---- channel reduction: accumulate at (c_chunk, HW), reduce once ------
    nfull = C // c_chunk
    rem = C - nfull * c_chunk

    sum_rows = []
    max_rows = []
    for b in range(nb):
        def accum(c0, s, m):
            blk = x_ref[b, pl.ds(c0, c_chunk), :].astype(jnp.float32)
            return s + blk, jnp.maximum(m, blk)

        s = jnp.zeros((c_chunk, HW), jnp.float32)
        m = jnp.full((c_chunk, HW), -jnp.inf, jnp.float32)
        if nfull <= 4:
            for i in range(nfull):                     # static unroll
                s, m = accum(i * c_chunk, s, m)
        else:
            def body(i, carry):
                cs, cm = carry
                c0 = pl.multiple_of(i * c_chunk, c_chunk)
                return accum(c0, cs, cm)
            s, m = lax.fori_loop(0, nfull, body, (s, m))
        if rem > 0:
            # clamped final chunk: only the last `rem` rows are new channels
            c0 = C - c_chunk                            # static, >= 0
            blk = x_ref[b, c0:c0 + c_chunk, :].astype(jnp.float32)
            fresh = (lax.broadcasted_iota(jnp.int32, (c_chunk, 1), 0)
                     >= (c_chunk - rem))
            s = s + jnp.where(fresh, blk, 0.0)
            m = jnp.maximum(m, jnp.where(fresh, blk, -jnp.inf))
        sum_rows.append(jnp.sum(s, axis=0, keepdims=True))   # (1, HW) = C*avg
        max_rows.append(jnp.max(m, axis=0, keepdims=True))    # (1, HW)

    sum_all = sum_rows[0] if nb == 1 else jnp.concatenate(sum_rows, axis=0)
    max_all = max_rows[0] if nb == 1 else jnp.concatenate(max_rows, axis=0)
    # lpad is 128-aligned -> aligned interior store
    sum_pad_ref[:, lpad:lpad + HW] = sum_all
    max_pad_ref[:, lpad:lpad + HW] = max_all
    # ssum == C * avg ; the 1/C factor lives in the avg half of w_ref.

    # ---- 7x7 conv + sigmoid + apply, strip-mined over the lane axis --------
    strips = []
    p0 = 0
    while p0 < HW:
        s_len = min(lane_strip, HW - p0)
        strips.append((p0, s_len))
        p0 += s_len

    for (p0, S) in strips:
        # w-coordinate of each flat pixel in this strip (in-kernel iota)
        wcoord = (lax.broadcasted_iota(jnp.int32, (1, S), 1) + p0) % W
        masks = {}
        for dw in range(-pad, pad + 1):
            if dw == 0:
                masks[dw] = None
            elif dw > 0:
                masks[dw] = wcoord < (W - dw)          # w + dw < W
            else:
                masks[dw] = wcoord >= (-dw)            # w + dw >= 0

        acc = jnp.zeros((nb, S), jnp.float32)
        for ki in range(ksize):
            for kj in range(ksize):
                dh, dw = ki - pad, kj - pad
                off = lpad + dh * W + dw + p0          # static, always >= 0
                w_avg = w_ref[ki * ksize + kj]         # scales the channel sum
                w_max = w_ref[kk + ki * ksize + kj]
                tap = (w_avg * sum_pad_ref[:, off:off + S]
                       + w_max * max_pad_ref[:, off:off + S])
                if masks[dw] is not None:
                    tap = jnp.where(masks[dw], tap, 0.0)
                acc = acc + tap

        attn = jax.nn.sigmoid(acc)                     # (nb, S) f32
        # bf16 (etc.) inputs: multiply in the native dtype; f32 stays f32.
        attn_x = attn if o_ref.dtype == jnp.float32 else attn.astype(o_ref.dtype)

        for b in range(nb):
            xv = x_ref[b, :, p0:p0 + S]                # (C, S), native dtype
            o_ref[b, :, p0:p0 + S] = (xv * attn_x[b:b + 1, :]).astype(o_ref.dtype)


def _pick_nb(N, elem_bytes, max_nb=8, budget=4 << 20):
    """Largest divisor of N (<= 8) whose block fits the budget while keeping
    the grid length >= 2 (so both v7x TensorCores stay fed)."""
    nb = 1
    for d in range(2, max_nb + 1):
        if N % d == 0 and d * elem_bytes <= budget and (N // d) >= 2:
            nb = d
    return nb


@functools.partial(jax.jit, static_argnames=("kernel_size",))
def spatial_attention(x, weight, kernel_size=7):
    """x: (N, C, H, W); weight: (1, 2, k, k) conv2d weight (no bias)."""
    N, C, H, W = x.shape
    HW = H * W
    k = kernel_size
    pad = k // 2
    lpad = ((pad * (W + 1) + 127) // 128) * 128        # 128-aligned flat margin
    PHW = lpad + HW + lpad

    # (N, C, H, W) -> (N, C, H*W): free bitcast, lane-dense loads and stores.
    x_flat = x.reshape(N, C, HW)

    # Fold 1/C into the avg half so the kernel can use the raw channel sum.
    w2 = weight.astype(jnp.float32).reshape(2, k * k)
    w_flat = jnp.concatenate([w2[0] / C, w2[1]])       # (2*k*k,)

    # Sublane-aligned channel chunk (masked remainder handled in-kernel).
    if C <= 8:
        c_chunk = C
    else:
        c_chunk = min(32, (C // 8) * 8)

    elem_bytes = C * HW * x.dtype.itemsize
    nb = _pick_nb(N, elem_bytes)
    lane_strip = 512

    block_bytes = nb * C * HW * x.dtype.itemsize
    scratch_bytes = 2 * max(nb, 8) * PHW * 4
    need = 2 * 2 * block_bytes + scratch_bytes + (8 << 20)
    vmem_limit = int(min(100 << 20, max(32 << 20, need)))

    kernel = functools.partial(
        _spatial_attention_kernel, ksize=k, C=C, H=H, W=W, nb=nb,
        c_chunk=c_chunk, lpad=lpad, lane_strip=lane_strip)

    y_flat = pl.pallas_call(
        kernel,
        out_shape=jax.ShapeDtypeStruct((N, C, HW), x.dtype),
        grid=(N // nb,),
        in_specs=[
            pl.BlockSpec(memory_space=pltpu.SMEM),              # conv weights
            pl.BlockSpec((nb, C, HW), lambda n: (n, 0, 0)),     # x block
        ],
        out_specs=pl.BlockSpec((nb, C, HW), lambda n: (n, 0, 0)),
        scratch_shapes=[pltpu.VMEM((nb, PHW), jnp.float32),     # padded sum map
                        pltpu.VMEM((nb, PHW), jnp.float32)],    # padded max map
        compiler_params=pltpu.CompilerParams(
            dimension_semantics=("parallel",),
            vmem_limit_bytes=vmem_limit),
    )(w_flat, x_flat)
    return y_flat.reshape(N, C, H, W)


def _reference(x, weight, kernel_size=7):
    """Pure-JAX reference mirroring the PyTorch forward (for validation)."""
    pad = kernel_size // 2
    avg = jnp.mean(x, axis=1, keepdims=True)
    mx = jnp.max(x, axis=1, keepdims=True)
    out = jnp.concatenate([avg, mx], axis=1)                    # (N, 2, H, W)
    conv = jax.lax.conv_general_dilated(
        out.astype(jnp.float32), weight.astype(jnp.float32),
        window_strides=(1, 1),
        padding=((pad, pad), (pad, pad)),
        dimension_numbers=("NCHW", "OIHW", "NCHW"))
    return (x * jax.nn.sigmoid(conv)).astype(x.dtype)


if __name__ == "__main__":
    key = jax.random.PRNGKey(0)
    ksize = 7

    # Case 1: the module's nominal small shape.
    # Case 2: exercises batch blocking (nb=2), the masked remainder channel
    #         chunk (C=12), and multi-strip conv (HW=576 > 512).
    cases = [(2, 4, 16, 16), (4, 12, 24, 24)]

    for shape in cases:
        key, kx, kw = jax.random.split(key, 3)
        x = jax.random.normal(kx, shape, dtype=jnp.float32)
        # Conv weight shape from nn.Conv2d(2, 1, kernel_size, bias=False).
        weight = 0.1 * jax.random.normal(kw, (1, 2, ksize, ksize),
                                         dtype=jnp.float32)

        y = spatial_attention(x, weight, kernel_size=ksize)
        y = jax.block_until_ready(y)

        y_ref = _reference(x, weight, kernel_size=ksize)
        assert y.shape == shape
        assert jnp.allclose(y, y_ref, atol=1e-4, rtol=1e-4), \
            f"mismatch vs reference at shape {shape}"

    print("KERNEL_OK")
</pallas_src>

<mosaic_0001>
module attributes {stable_mosaic.version = 11 : i64} {
  func.func @_spatial_attention_kernel(%arg0: i32, %arg1: memref<98xf32, #tpu.memory_space<smem>>, %arg2: memref<1x4x256xf32, #tpu.memory_space<vmem>>, %arg3: memref<1x4x256xf32, #tpu.memory_space<vmem>>, %arg4: memref<1x512xf32, #tpu.memory_space<vmem>>, %arg5: memref<1x512xf32, #tpu.memory_space<vmem>>) attributes {dimension_semantics = [#tpu.dimension_semantics<parallel>], iteration_bounds = array<i64: 2>, scalar_prefetch = 0 : i64, scratch_operands = 2 : i64, tpu.core_type = #tpu.core_type<tc>, window_params = [{transform_indices = @transform_0, window_bounds = array<i64: 98>}, {transform_indices = @transform_1, window_bounds = array<i64: 1, 4, 256>}, {transform_indices = @transform_2, window_bounds = array<i64: 1, 4, 256>}]} {
    %cst = arith.constant 0.000000e+00 : f32
    %0 = vector.broadcast %cst : f32 to vector<1x128xf32>
    %c0 = arith.constant 0 : index
    %c0_0 = arith.constant 0 : index
    %1 = vector.load %arg4[%c0, %c0_0] : memref<1x512xf32, #tpu.memory_space<vmem>>, vector<1x128xf32>
    tpu.vector_store %arg4[%c0, %c0_0], %0 {strides = array<i32>} : memref<1x512xf32, #tpu.memory_space<vmem>>, vector<1x128xf32>,
    %c0_1 = arith.constant 0 : index
    %c384 = arith.constant 384 : index
    %2 = vector.load %arg4[%c0_1, %c384] : memref<1x512xf32, #tpu.memory_space<vmem>>, vector<1x128xf32>
    tpu.vector_store %arg4[%c0_1, %c384], %0 {strides = array<i32>} : memref<1x512xf32, #tpu.memory_space<vmem>>, vector<1x128xf32>,
    %c0_2 = arith.constant 0 : index
    %c0_3 = arith.constant 0 : index
    %3 = vector.load %arg5[%c0_2, %c0_3] : memref<1x512xf32, #tpu.memory_space<vmem>>, vector<1x128xf32>
    tpu.vector_store %arg5[%c0_2, %c0_3], %0 {strides = array<i32>} : memref<1x512xf32, #tpu.memory_space<vmem>>, vector<1x128xf32>,
    %c0_4 = arith.constant 0 : index
    %c384_5 = arith.constant 384 : index
    %4 = vector.load %arg5[%c0_4, %c384_5] : memref<1x512xf32, #tpu.memory_space<vmem>>, vector<1x128xf32>
    tpu.vector_store %arg5[%c0_4, %c384_5], %0 {strides = array<i32>} : memref<1x512xf32, #tpu.memory_space<vmem>>, vector<1x128xf32>,
    %cst_6 = arith.constant 0.000000e+00 : f32
    %5 = vector.broadcast %cst_6 : f32 to vector<4x256xf32>
    %cst_7 = arith.constant 0xFF800000 : f32
    %6 = vector.broadcast %cst_7 : f32 to vector<4x256xf32>
    %c0_8 = arith.constant 0 : index
    %c0_9 = arith.constant 0 : index
    %c0_10 = arith.constant 0 : index
    %7 = vector.load %arg2[%c0_8, %c0_9, %c0_10] : memref<1x4x256xf32, #tpu.memory_space<vmem>>, vector<1x4x256xf32>
    %8 = vector.shape_cast %7 : vector<1x4x256xf32> to vector<4x256xf32>
    %9 = arith.addf %5, %8 : vector<4x256xf32>
    %10 = arith.maximumf %6, %8 : vector<4x256xf32>
    %cst_11 = arith.constant dense<0.000000e+00> : vector<256xf32>
    %11 = vector.multi_reduction <add>, %9, %cst_11 [0] : vector<4x256xf32> to vector<256xf32>
    %12 = vector.shape_cast %11 : vector<256xf32> to vector<1x256xf32>
    %cst_12 = arith.constant dense<0xFF800000> : vector<256xf32>
    %13 = vector.multi_reduction <maximumf>, %10, %cst_12 [0] : vector<4x256xf32> to vector<256xf32>
    %14 = vector.shape_cast %13 : vector<256xf32> to vector<1x256xf32>
    %c0_13 = arith.constant 0 : index
    %c128 = arith.constant 128 : index
    %15 = vector.load %arg4[%c0_13, %c128] : memref<1x512xf32, #tpu.memory_space<vmem>>, vector<1x256xf32>
    tpu.vector_store %arg4[%c0_13, %c128], %12 {strides = array<i32>} : memref<1x512xf32, #tpu.memory_space<vmem>>, vector<1x256xf32>,
    %c0_14 = arith.constant 0 : index
    %c128_15 = arith.constant 128 : index
    %16 = vector.load %arg5[%c0_14, %c128_15] : memref<1x512xf32, #tpu.memory_space<vmem>>, vector<1x256xf32>
    tpu.vector_store %arg5[%c0_14, %c128_15], %14 {strides = array<i32>} : memref<1x512xf32, #tpu.memory_space<vmem>>, vector<1x256xf32>,
    %17 = tpu.iota {dimensions = array<i32: 1>} : vector<1x256xi32>
    %c0_i32 = arith.constant 0 : i32
    %18 = vector.broadcast %c0_i32 : i32 to vector<1x256xi32>
    %19 = arith.addi %17, %18 : vector<1x256xi32>
    %c16_i32 = arith.constant 16 : i32
    %c0_i32_16 = arith.constant 0 : i32
    %20 = arith.cmpi eq, %c16_i32, %c0_i32_16 : i32
    %c1_i32 = arith.constant 1 : i32
    %21 = arith.select %20, %c1_i32, %c16_i32 : i32
    %22 = vector.broadcast %21 : i32 to vector<1x256xi32>
    %23 = arith.remsi %19, %22 : vector<1x256xi32>
    %c0_i32_17 = arith.constant 0 : i32
    %24 = vector.broadcast %c0_i32_17 : i32 to vector<1x256xi32>
    %25 = arith.cmpi ne, %23, %24 : vector<1x256xi32>
    %c0_i32_18 = arith.constant 0 : i32
    %26 = vector.broadcast %c0_i32_18 : i32 to vector<1x256xi32>
    %27 = arith.cmpi slt, %23, %26 : vector<1x256xi32>
    %c0_i32_19 = arith.constant 0 : i32
    %28 = arith.cmpi slt, %21, %c0_i32_19 : i32
    %29 = vector.broadcast %28 : i1 to vector<1x256xi1>
    %30 = vector.broadcast %29 : vector<1x256xi1> to vector<1x256xi1>
    %31 = arith.xori %27, %30 : vector<1x256xi1>
    %32 = arith.andi %31, %25 : vector<1x256xi1>
    %33 = vector.broadcast %21 : i32 to vector<1x256xi32>
    %34 = arith.addi %23, %33 : vector<1x256xi32>
    %35 = arith.select %32, %34, %23 : vector<1x256xi1>, vector<1x256xi32>
    %c3_i32 = arith.constant 3 : i32
    %36 = vector.broadcast %c3_i32 : i32 to vector<1x256xi32>
    %37 = arith.cmpi sge, %35, %36 : vector<1x256xi32>
    %c2_i32 = arith.constant 2 : i32
    %38 = vector.broadcast %c2_i32 : i32 to vector<1x256xi32>
    %39 = arith.cmpi sge, %35, %38 : vector<1x256xi32>
    %c1_i32_20 = arith.constant 1 : i32
    %40 = vector.broadcast %c1_i32_20 : i32 to vector<1x256xi32>
    %41 = arith.cmpi sge, %35, %40 : vector<1x256xi32>
    %c15_i32 = arith.constant 15 : i32
    %42 = vector.broadcast %c15_i32 : i32 to vector<1x256xi32>
    %43 = arith.cmpi slt, %35, %42 : vector<1x256xi32>
    %c14_i32 = arith.constant 14 : i32
    %44 = vector.broadcast %c14_i32 : i32 to vector<1x256xi32>
    %45 = arith.cmpi slt, %35, %44 : vector<1x256xi32>
    %c13_i32 = arith.constant 13 : i32
    %46 = vector.broadcast %c13_i32 : i32 to vector<1x256xi32>
    %47 = arith.cmpi slt, %35, %46 : vector<1x256xi32>
    %cst_21 = arith.constant 0.000000e+00 : f32
    %48 = vector.broadcast %cst_21 : f32 to vector<1x256xf32>
    %c0_22 = arith.constant 0 : index
    %49 = memref.load %arg1[%c0_22] : memref<98xf32, #tpu.memory_space<smem>>
    %c49 = arith.constant 49 : index
    %50 = memref.load %arg1[%c49] : memref<98xf32, #tpu.memory_space<smem>>
    %c0_23 = arith.constant 0 : index
    %c77 = arith.constant 77 : index
    %51 = vector.load %arg4[%c0_23, %c77] : memref<1x512xf32, #tpu.memory_space<vmem>>, vector<1x256xf32>
    %52 = vector.broadcast %49 : f32 to vector<1x256xf32>
    %53 = arith.mulf %52, %51 : vector<1x256xf32>
    %c0_24 = arith.constant 0 : index
    %c77_25 = arith.constant 77 : index
    %54 = vector.load %arg5[%c0_24, %c77_25] : memref<1x512xf32, #tpu.memory_space<vmem>>, vector<1x256xf32>
    %55 = vector.broadcast %50 : f32 to vector<1x256xf32>
    %56 = arith.mulf %55, %54 : vector<1x256xf32>
    %57 = arith.addf %53, %56 : vector<1x256xf32>
    %cst_26 = arith.constant 0.000000e+00 : f32
    %58 = vector.broadcast %cst_26 : f32 to vector<1x256xf32>
    %59 = arith.select %37, %57, %58 : vector<1x256xi1>, vector<1x256xf32>
    %60 = arith.addf %48, %59 : vector<1x256xf32>
    %c1 = arith.constant 1 : index
    %61 = memref.load %arg1[%c1] : memref<98xf32, #tpu.memory_space<smem>>
    %c50 = arith.constant 50 : index
    %62 = memref.load %arg1[%c50] : memref<98xf32, #tpu.memory_space<smem>>
    %c0_27 = arith.constant 0 : index
    %c78 = arith.constant 78 : index
    %63 = vector.load %arg4[%c0_27, %c78] : memref<1x512xf32, #tpu.memory_space<vmem>>, vector<1x256xf32>
    %64 = vector.broadcast %61 : f32 to vector<1x256xf32>
    %65 = arith.mulf %64, %63 : vector<1x256xf32>
    %c0_28 = arith.constant 0 : index
    %c78_29 = arith.constant 78 : index
    %66 = vector.load %arg5[%c0_28, %c78_29] : memref<1x512xf32, #tpu.memory_space<vmem>>, vector<1x256xf32>
    %67 = vector.broadcast %62 : f32 to vector<1x256xf32>
    %68 = arith.mulf %67, %66 : vector<1x256xf32>
    %69 = arith.addf %65, %68 : vector<1x256xf32>
    %cst_30 = arith.constant 0.000000e+00 : f32
    %70 = vector.broadcast %cst_30 : f32 to vector<1x256xf32>
    %71 = arith.select %39, %69, %70 : vector<1x256xi1>, vector<1x256xf32>
    %72 = arith.addf %60, %71 : vector<1x256xf32>
    %c2 = arith.constant 2 : index
    %73 = memref.load %arg1[%c2] : memref<98xf32, #tpu.memory_space<smem>>
    %c51 = arith.constant 51 : index
    %74 = memref.load %arg1[%c51] : memref<98xf32, #tpu.memory_space<smem>>
    %c0_31 = arith.constant 0 : index
    %c79 = arith.constant 79 : index
    %75 = vector.load %arg4[%c0_31, %c79] : memref<1x512xf32, #tpu.memory_space<vmem>>, vector<1x256xf32>
    %76 = vector.broadcast %73 : f32 to vector<1x256xf32>
    %77 = arith.mulf %76, %75 : vector<1x256xf32>
    %c0_32 = arith.constant 0 : index
    %c79_33 = arith.constant 79 : index
    %78 = vector.load %arg5[%c0_32, %c79_33] : memref<1x512xf32, #tpu.memory_space<vmem>>, vector<1x256xf32>
    %79 = vector.broadcast %74 : f32 to vector<1x256xf32>
    %80 = arith.mulf %79, %78 : vector<1x256xf32>
    %81 = arith.addf %77, %80 : vector<1x256xf32>
    %cst_34 = arith.constant 0.000000e+00 : f32
    %82 = vector.broadcast %cst_34 : f32 to vector<1x256xf32>
    %83 = arith.select %41, %81, %82 : vector<1x256xi1>, vector<1x256xf32>
    %84 = arith.addf %72, %83 : vector<1x256xf32>
    %c3 = arith.constant 3 : index
    %85 = memref.load %arg1[%c3] : memref<98xf32, #tpu.memory_space<smem>>
    %c52 = arith.constant 52 : index
    %86 = memref.load %arg1[%c52] : memref<98xf32, #tpu.memory_space<smem>>
    %c0_35 = arith.constant 0 : index
    %c80 = arith.constant 80 : index
    %87 = vector.load %arg4[%c0_35, %c80] : memref<1x512xf32, #tpu.memory_space<vmem>>, vector<1x256xf32>
    %88 = vector.broadcast %85 : f32 to vector<1x256xf32>
    %89 = arith.mulf %88, %87 : vector<1x256xf32>
    %c0_36 = arith.constant 0 : index
    %c80_37 = arith.constant 80 : index
    %90 = vector.load %arg5[%c0_36, %c80_37] : memref<1x512xf32, #tpu.memory_space<vmem>>, vector<1x256xf32>
    %91 = vector.broadcast %86 : f32 to vector<1x256xf32>
    %92 = arith.mulf %91, %90 : vector<1x256xf32>
    %93 = arith.addf %89, %92 : vector<1x256xf32>
    %94 = arith.addf %84, %93 : vector<1x256xf32>
    %c4 = arith.constant 4 : index
    %95 = memref.load %arg1[%c4] : memref<98xf32, #tpu.memory_space<smem>>
    %c53 = arith.constant 53 : index
    %96 = memref.load %arg1[%c53] : memref<98xf32, #tpu.memory_space<smem>>
    %c0_38 = arith.constant 0 : index
    %c81 = arith.constant 81 : index
    %97 = vector.load %arg4[%c0_38, %c81] : memref<1x512xf32, #tpu.memory_space<vmem>>, vector<1x256xf32>
    %98 = vector.broadcast %95 : f32 to vector<1x256xf32>
    %99 = arith.mulf %98, %97 : vector<1x256xf32>
    %c0_39 = arith.constant 0 : index
    %c81_40 = arith.constant 81 : index
    %100 = vector.load %arg5[%c0_39, %c81_40] : memref<1x512xf32, #tpu.memory_space<vmem>>, vector<1x256xf32>
    %101 = vector.broadcast %96 : f32 to vector<1x256xf32>
    %102 = arith.mulf %101, %100 : vector<1x256xf32>
    %103 = arith.addf %99, %102 : vector<1x256xf32>
    %cst_41 = arith.constant 0.000000e+00 : f32
    %104 = vector.broadcast %cst_41 : f32 to vector<1x256xf32>
    %105 = arith.select %43, %103, %104 : vector<1x256xi1>, vector<1x256xf32>
    %106 = arith.addf %94, %105 : vector<1x256xf32>
    %c5 = arith.constant 5 : index
    %107 = memref.load %arg1[%c5] : memref<98xf32, #tpu.memory_space<smem>>
    %c54 = arith.constant 54 : index
    %108 = memref.load %arg1[%c54] : memref<98xf32, #tpu.memory_space<smem>>
    %c0_42 = arith.constant 0 : index
    %c82 = arith.constant 82 : index
    %109 = vector.load %arg4[%c0_42, %c82] : memref<1x512xf32, #tpu.memory_space<vmem>>, vector<1x256xf32>
    %110 = vector.broadcast %107 : f32 to vector<1x256xf32>
    %111 = arith.mulf %110, %109 : vector<1x256xf32>
    %c0_43 = arith.constant 0 : index
    %c82_44 = arith.constant 82 : index
    %112 = vector.load %arg5[%c0_43, %c82_44] : memref<1x512xf32, #tpu.memory_space<vmem>>, vector<1x256xf32>
    %113 = vector.broadcast %108 : f32 to vector<1x256xf32>
    %114 = arith.mulf %113, %112 : vector<1x256xf32>
    %115 = arith.addf %111, %114 : vector<1x256xf32>
    %cst_45 = arith.constant 0.000000e+00 : f32
    %116 = vector.broadcast %cst_45 : f32 to vector<1x256xf32>
    %117 = arith.select %45, %115, %116 : vector<1x256xi1>, vector<1x256xf32>
    %118 = arith.addf %106, %117 : vector<1x256xf32>
    %c6 = arith.constant 6 : index
    %119 = memref.load %arg1[%c6] : memref<98xf32, #tpu.memory_space<smem>>
    %c55 = arith.constant 55 : index
    %120 = memref.load %arg1[%c55] : memref<98xf32, #tpu.memory_space<smem>>
    %c0_46 = arith.constant 0 : index
    %c83 = arith.constant 83 : index
    %121 = vector.load %arg4[%c0_46, %c83] : memref<1x512xf32, #tpu.memory_space<vmem>>, vector<1x256xf32>
    %122 = vector.broadcast %119 : f32 to vector<1x256xf32>
    %123 = arith.mulf %122, %121 : vector<1x256xf32>
    %c0_47 = arith.constant 0 : index
    %c83_48 = arith.constant 83 : index
    %124 = vector.load %arg5[%c0_47, %c83_48] : memref<1x512xf32, #tpu.memory_space<vmem>>, vector<1x256xf32>
    %125 = vector.broadcast %120 : f32 to vector<1x256xf32>
    %126 = arith.mulf %125, %124 : vector<1x256xf32>
    %127 = arith.addf %123, %126 : vector<1x256xf32>
    %cst_49 = arith.constant 0.000000e+00 : f32
    %128 = vector.broadcast %cst_49 : f32 to vector<1x256xf32>
    %129 = arith.select %47, %127, %128 : vector<1x256xi1>, vector<1x256xf32>
    %130 = arith.addf %118, %129 : vector<1x256xf32>
    %c7 = arith.constant 7 : index
    %131 = memref.load %arg1[%c7] : memref<98xf32, #tpu.memory_space<smem>>
    %c56 = arith.constant 56 : index
    %132 = memref.load %arg1[%c56] : memref<98xf32, #tpu.memory_space<smem>>
    %c0_50 = arith.constant 0 : index
    %c93 = arith.constant 93 : index
    %133 = vector.load %arg4[%c0_50, %c93] : memref<1x512xf32, #tpu.memory_space<vmem>>, vector<1x256xf32>
    %134 = vector.broadcast %131 : f32 to vector<1x256xf32>
    %135 = arith.mulf %134, %133 : vector<1x256xf32>
    %c0_51 = arith.constant 0 : index
    %c93_52 = arith.constant 93 : index
    %136 = vector.load %arg5[%c0_51, %c93_52] : memref<1x512xf32, #tpu.memory_space<vmem>>, vector<1x256xf32>
    %137 = vector.broadcast %132 : f32 to vector<1x256xf32>
    %138 = arith.mulf %137, %136 : vector<1x256xf32>
    %139 = arith.addf %135, %138 : vector<1x256xf32>
    %cst_53 = arith.constant 0.000000e+00 : f32
    %140 = vector.broadcast %cst_53 : f32 to vector<1x256xf32>
    %141 = arith.select %37, %139, %140 : vector<1x256xi1>, vector<1x256xf32>
    %142 = arith.addf %130, %141 : vector<1x256xf32>
    %c8 = arith.constant 8 : index
    %143 = memref.load %arg1[%c8] : memref<98xf32, #tpu.memory_space<smem>>
    %c57 = arith.constant 57 : index
    %144 = memref.load %arg1[%c57] : memref<98xf32, #tpu.memory_space<smem>>
    %c0_54 = arith.constant 0 : index
    %c94 = arith.constant 94 : index
    %145 = vector.load %arg4[%c0_54, %c94] : memref<1x512xf32, #tpu.memory_space<vmem>>, vector<1x256xf32>
    %146 = vector.broadcast %143 : f32 to vector<1x256xf32>
    %147 = arith.mulf %146, %145 : vector<1x256xf32>
    %c0_55 = arith.constant 0 : index
    %c94_56 = arith.constant 94 : index
    %148 = vector.load %arg5[%c0_55, %c94_56] : memref<1x512xf32, #tpu.memory_space<vmem>>, vector<1x256xf32>
    %149 = vector.broadcast %144 : f32 to vector<1x256xf32>
    %150 = arith.mulf %149, %148 : vector<1x256xf32>
    %151 = arith.addf %147, %150 : vector<1x256xf32>
    %cst_57 = arith.constant 0.000000e+00 : f32
    %152 = vector.broadcast %cst_57 : f32 to vector<1x256xf32>
    %153 = arith.select %39, %151, %152 : vector<1x256xi1>, vector<1x256xf32>
    %154 = arith.addf %142, %153 : vector<1x256xf32>
    %c9 = arith.constant 9 : index
    %155 = memref.load %arg1[%c9] : memref<98xf32, #tpu.memory_space<smem>>
    %c58 = arith.constant 58 : index
    %156 = memref.load %arg1[%c58] : memref<98xf32, #tpu.memory_space<smem>>
    %c0_58 = arith.constant 0 : index
    %c95 = arith.constant 95 : index
    %157 = vector.load %arg4[%c0_58, %c95] : memref<1x512xf32, #tpu.memory_space<vmem>>, vector<1x256xf32>
    %158 = vector.broadcast %155 : f32 to vector<1x256xf32>
    %159 = arith.mulf %158, %157 : vector<1x256xf32>
    %c0_59 = arith.constant 0 : index
    %c95_60 = arith.constant 95 : index
    %160 = vector.load %arg5[%c0_59, %c95_60] : memref<1x512xf32, #tpu.memory_space<vmem>>, vector<1x256xf32>
    %161 = vector.broadcast %156 : f32 to vector<1x256xf32>
    %162 = arith.mulf %161, %160 : vector<1x256xf32>
    %163 = arith.addf %159, %162 : vector<1x256xf32>
    %cst_61 = arith.constant 0.000000e+00 : f32
    %164 = vector.broadcast %cst_61 : f32 to vector<1x256xf32>
    %165 = arith.select %41, %163, %164 : vector<1x256xi1>, vector<1x256xf32>
    %166 = arith.addf %154, %165 : vector<1x256xf32>
    %c10 = arith.constant 10 : index
    %167 = memref.load %arg1[%c10] : memref<98xf32, #tpu.memory_space<smem>>
    %c59 = arith.constant 59 : index
    %168 = memref.load %arg1[%c59] : memref<98xf32, #tpu.memory_space<smem>>
    %c0_62 = arith.constant 0 : index
    %c96 = arith.constant 96 : index
    %169 = vector.load %arg4[%c0_62, %c96] : memref<1x512xf32, #tpu.memory_space<vmem>>, vector<1x256xf32>
    %170 = vector.broadcast %167 : f32 to vector<1x256xf32>
    %171 = arith.mulf %170, %169 : vector<1x256xf32>
    %c0_63 = arith.constant 0 : index
    %c96_64 = arith.constant 96 : index
    %172 = vector.load %arg5[%c0_63, %c96_64] : memref<1x512xf32, #tpu.memory_space<vmem>>, vector<1x256xf32>
    %173 = vector.broadcast %168 : f32 to vector<1x256xf32>
    %174 = arith.mulf %173, %172 : vector<1x256xf32>
    %175 = arith.addf %171, %174 : vector<1x256xf32>
    %176 = arith.addf %166, %175 : vector<1x256xf32>
    %c11 = arith.constant 11 : index
    %177 = memref.load %arg1[%c11] : memref<98xf32, #tpu.memory_space<smem>>
    %c60 = arith.constant 60 : index
    %178 = memref.load %arg1[%c60] : memref<98xf32, #tpu.memory_space<smem>>
    %c0_65 = arith.constant 0 : index
    %c97 = arith.constant 97 : index
    %179 = vector.load %arg4[%c0_65, %c97] : memref<1x512xf32, #tpu.memory_space<vmem>>, vector<1x256xf32>
    %180 = vector.broadcast %177 : f32 to vector<1x256xf32>
    %181 = arith.mulf %180, %179 : vector<1x256xf32>
    %c0_66 = arith.constant 0 : index
    %c97_67 = arith.constant 97 : index
    %182 = vector.load %arg5[%c0_66, %c97_67] : memref<1x512xf32, #tpu.memory_space<vmem>>, vector<1x256xf32>
    %183 = vector.broadcast %178 : f32 to vector<1x256xf32>
    %184 = arith.mulf %183, %182 : vector<1x256xf32>
    %185 = arith.addf %181, %184 : vector<1x256xf32>
    %cst_68 = arith.constant 0.000000e+00 : f32
    %186 = vector.broadcast %cst_68 : f32 to vector<1x256xf32>
    %187 = arith.select %43, %185, %186 : vector<1x256xi1>, vector<1x256xf32>
    %188 = arith.addf %176, %187 : vector<1x256xf32>
    %c12 = arith.constant 12 : index
    %189 = memref.load %arg1[%c12] : memref<98xf32, #tpu.memory_space<smem>>
    %c61 = arith.constant 61 : index
    %190 = memref.load %arg1[%c61] : memref<98xf32, #tpu.memory_space<smem>>
    %c0_69 = arith.constant 0 : index
    %c98 = arith.constant 98 : index
    %191 = vector.load %arg4[%c0_69, %c98] : memref<1x512xf32, #tpu.memory_space<vmem>>, vector<1x256xf32>
    %192 = vector.broadcast %189 : f32 to vector<1x256xf32>
    %193 = arith.mulf %192, %191 : vector<1x256xf32>
    %c0_70 = arith.constant 0 : index
    %c98_71 = arith.constant 98 : index
    %194 = vector.load %arg5[%c0_70, %c98_71] : memref<1x512xf32, #tpu.memory_space<vmem>>, vector<1x256xf32>
    %195 = vector.broadcast %190 : f32 to vector<1x256xf32>
    %196 = arith.mulf %195, %194 : vector<1x256xf32>
    %197 = arith.addf %193, %196 : vector<1x256xf32>
    %cst_72 = arith.constant 0.000000e+00 : f32
    %198 = vector.broadcast %cst_72 : f32 to vector<1x256xf32>
    %199 = arith.select %45, %197, %198 : vector<1x256xi1>, vector<1x256xf32>
    %200 = arith.addf %188, %199 : vector<1x256xf32>
    %c13 = arith.constant 13 : index
    %201 = memref.load %arg1[%c13] : memref<98xf32, #tpu.memory_space<smem>>
    %c62 = arith.constant 62 : index
    %202 = memref.load %arg1[%c62] : memref<98xf32, #tpu.memory_space<smem>>
    %c0_73 = arith.constant 0 : index
    %c99 = arith.constant 99 : index
    %203 = vector.load %arg4[%c0_73, %c99] : memref<1x512xf32, #tpu.memory_space<vmem>>, vector<1x256xf32>
    %204 = vector.broadcast %201 : f32 to vector<1x256xf32>
    %205 = arith.mulf %204, %203 : vector<1x256xf32>
    %c0_74 = arith.constant 0 : index
    %c99_75 = arith.constant 99 : index
    %206 = vector.load %arg5[%c0_74, %c99_75] : memref<1x512xf32, #tpu.memory_space<vmem>>, vector<1x256xf32>
    %207 = vector.broadcast %202 : f32 to vector<1x256xf32>
    %208 = arith.mulf %207, %206 : vector<1x256xf32>
    %209 = arith.addf %205, %208 : vector<1x256xf32>
    %cst_76 = arith.constant 0.000000e+00 : f32
    %210 = vector.broadcast %cst_76 : f32 to vector<1x256xf32>
    %211 = arith.select %47, %209, %210 : vector<1x256xi1>, vector<1x256xf32>
    %212 = arith.addf %200, %211 : vector<1x256xf32>
    %c14 = arith.constant 14 : index
    %213 = memref.load %arg1[%c14] : memref<98xf32, #tpu.memory_space<smem>>
    %c63 = arith.constant 63 : index
    %214 = memref.load %arg1[%c63] : memref<98xf32, #tpu.memory_space<smem>>
    %c0_77 = arith.constant 0 : index
    %c109 = arith.constant 109 : index
    %215 = vector.load %arg4[%c0_77, %c109] : memref<1x512xf32, #tpu.memory_space<vmem>>, vector<1x256xf32>
    %216 = vector.broadcast %213 : f32 to vector<1x256xf32>
    %217 = arith.mulf %216, %215 : vector<1x256xf32>
    %c0_78 = arith.constant 0 : index
    %c109_79 = arith.constant 109 : index
    %218 = vector.load %arg5[%c0_78, %c109_79] : memref<1x512xf32, #tpu.memory_space<vmem>>, vector<1x256xf32>
    %219 = vector.broadcast %214 : f32 to vector<1x256xf32>
    %220 = arith.mulf %219, %218 : vector<1x256xf32>
    %221 = arith.addf %217, %220 : vector<1x256xf32>
    %cst_80 = arith.constant 0.000000e+00 : f32
    %222 = vector.broadcast %cst_80 : f32 to vector<1x256xf32>
    %223 = arith.select %37, %221, %222 : vector<1x256xi1>, vector<1x256xf32>
    %224 = arith.addf %212, %223 : vector<1x256xf32>
    %c15 = arith.constant 15 : index
    %225 = memref.load %arg1[%c15] : memref<98xf32, #tpu.memory_space<smem>>
    %c64 = arith.constant 64 : index
    %226 = memref.load %arg1[%c64] : memref<98xf32, #tpu.memory_space<smem>>
    %c0_81 = arith.constant 0 : index
    %c110 = arith.constant 110 : index
    %227 = vector.load %arg4[%c0_81, %c110] : memref<1x512xf32, #tpu.memory_space<vmem>>, vector<1x256xf32>
    %228 = vector.broadcast %225 : f32 to vector<1x256xf32>
    %229 = arith.mulf %228, %227 : vector<1x256xf32>
    %c0_82 = arith.constant 0 : index
    %c110_83 = arith.constant 110 : index
    %230 = vector.load %arg5[%c0_82, %c110_83] : memref<1x512xf32, #tpu.memory_space<vmem>>, vector<1x256xf32>
    %231 = vector.broadcast %226 : f32 to vector<1x256xf32>
    %232 = arith.mulf %231, %230 : vector<1x256xf32>
    %233 = arith.addf %229, %232 : vector<1x256xf32>
    %cst_84 = arith.constant 0.000000e+00 : f32
    %234 = vector.broadcast %cst_84 : f32 to vector<1x256xf32>
    %235 = arith.select %39, %233, %234 : vector<1x256xi1>, vector<1x256xf32>
    %236 = arith.addf %224, %235 : vector<1x256xf32>
    %c16 = arith.constant 16 : index
    %237 = memref.load %arg1[%c16] : memref<98xf32, #tpu.memory_space<smem>>
    %c65 = arith.constant 65 : index
    %238 = memref.load %arg1[%c65] : memref<98xf32, #tpu.memory_space<smem>>
    %c0_85 = arith.constant 0 : index
    %c111 = arith.constant 111 : index
    %239 = vector.load %arg4[%c0_85, %c111] : memref<1x512xf32, #tpu.memory_space<vmem>>, vector<1x256xf32>
    %240 = vector.broadcast %237 : f32 to vector<1x256xf32>
    %241 = arith.mulf %240, %239 : vector<1x256xf32>
    %c0_86 = arith.constant 0 : index
    %c111_87 = arith.constant 111 : index
    %242 = vector.load %arg5[%c0_86, %c111_87] : memref<1x512xf32, #tpu.memory_space<vmem>>, vector<1x256xf32>
    %243 = vector.broadcast %238 : f32 to vector<1x256xf32>
    %244 = arith.mulf %243, %242 : vector<1x256xf32>
    %245 = arith.addf %241, %244 : vector<1x256xf32>
    %cst_88 = arith.constant 0.000000e+00 : f32
    %246 = vector.broadcast %cst_88 : f32 to vector<1x256xf32>
    %247 = arith.select %41, %245, %246 : vector<1x256xi1>, vector<1x256xf32>
    %248 = arith.addf %236, %247 : vector<1x256xf32>
    %c17 = arith.constant 17 : index
    %249 = memref.load %arg1[%c17] : memref<98xf32, #tpu.memory_space<smem>>
    %c66 = arith.constant 66 : index
    %250 = memref.load %arg1[%c66] : memref<98xf32, #tpu.memory_space<smem>>
    %c0_89 = arith.constant 0 : index
    %c112 = arith.constant 112 : index
    %251 = vector.load %arg4[%c0_89, %c112] : memref<1x512xf32, #tpu.memory_space<vmem>>, vector<1x256xf32>
    %252 = vector.broadcast %249 : f32 to vector<1x256xf32>
    %253 = arith.mulf %252, %251 : vector<1x256xf32>
    %c0_90 = arith.constant 0 : index
    %c112_91 = arith.constant 112 : index
    %254 = vector.load %arg5[%c0_90, %c112_91] : memref<1x512xf32, #tpu.memory_space<vmem>>, vector<1x256xf32>
    %255 = vector.broadcast %250 : f32 to vector<1x256xf32>
    %256 = arith.mulf %255, %254 : vector<1x256xf32>
    %257 = arith.addf %253, %256 : vector<1x256xf32>
    %258 = arith.addf %248, %257 : vector<1x256xf32>
    %c18 = arith.constant 18 : index
    %259 = memref.load %arg1[%c18] : memref<98xf32, #tpu.memory_space<smem>>
    %c67 = arith.constant 67 : index
    %260 = memref.load %arg1[%c67] : memref<98xf32, #tpu.memory_space<smem>>
    %c0_92 = arith.constant 0 : index
    %c113 = arith.constant 113 : index
    %261 = vector.load %arg4[%c0_92, %c113] : memref<1x512xf32, #tpu.memory_space<vmem>>, vector<1x256xf32>
    %262 = vector.broadcast %259 : f32 to vector<1x256xf32>
    %263 = arith.mulf %262, %261 : vector<1x256xf32>
    %c0_93 = arith.constant 0 : index
    %c113_94 = arith.constant 113 : index
    %264 = vector.load %arg5[%c0_93, %c113_94] : memref<1x512xf32, #tpu.memory_space<vmem>>, vector<1x256xf32>
    %265 = vector.broadcast %260 : f32 to vector<1x256xf32>
    %266 = arith.mulf %265, %264 : vector<1x256xf32>
    %267 = arith.addf %263, %266 : vector<1x256xf32>
    %cst_95 = arith.constant 0.000000e+00 : f32
    %268 = vector.broadcast %cst_95 : f32 to vector<1x256xf32>
    %269 = arith.select %43, %267, %268 : vector<1x256xi1>, vector<1x256xf32>
    %270 = arith.addf %258, %269 : vector<1x256xf32>
    %c19 = arith.constant 19 : index
    %271 = memref.load %arg1[%c19] : memref<98xf32, #tpu.memory_space<smem>>
    %c68 = arith.constant 68 : index
    %272 = memref.load %arg1[%c68] : memref<98xf32, #tpu.memory_space<smem>>
    %c0_96 = arith.constant 0 : index
    %c114 = arith.constant 114 : index
    %273 = vector.load %arg4[%c0_96, %c114] : memref<1x512xf32, #tpu.memory_space<vmem>>, vector<1x256xf32>
    %274 = vector.broadcast %271 : f32 to vector<1x256xf32>
    %275 = arith.mulf %274, %273 : vector<1x256xf32>
    %c0_97 = arith.constant 0 : index
    %c114_98 = arith.constant 114 : index
    %276 = vector.load %arg5[%c0_97, %c114_98] : memref<1x512xf32, #tpu.memory_space<vmem>>, vector<1x256xf32>
    %277 = vector.broadcast %272 : f32 to vector<1x256xf32>
    %278 = arith.mulf %277, %276 : vector<1x256xf32>
    %279 = arith.addf %275, %278 : vector<1x256xf32>
    %cst_99 = arith.constant 0.000000e+00 : f32
    %280 = vector.broadcast %cst_99 : f32 to vector<1x256xf32>
    %281 = arith.select %45, %279, %280 : vector<1x256xi1>, vector<1x256xf32>
    %282 = arith.addf %270, %281 : vector<1x256xf32>
    %c20 = arith.constant 20 : index
    %283 = memref.load %arg1[%c20] : memref<98xf32, #tpu.memory_space<smem>>
    %c69 = arith.constant 69 : index
    %284 = memref.load %arg1[%c69] : memref<98xf32, #tpu.memory_space<smem>>
    %c0_100 = arith.constant 0 : index
    %c115 = arith.constant 115 : index
    %285 = vector.load %arg4[%c0_100, %c115] : memref<1x512xf32, #tpu.memory_space<vmem>>, vector<1x256xf32>
    %286 = vector.broadcast %283 : f32 to vector<1x256xf32>
    %287 = arith.mulf %286, %285 : vector<1x256xf32>
    %c0_101 = arith.constant 0 : index
    %c115_102 = arith.constant 115 : index
    %288 = vector.load %arg5[%c0_101, %c115_102] : memref<1x512xf32, #tpu.memory_space<vmem>>, vector<1x256xf32>
    %289 = vector.broadcast %284 : f32 to vector<1x256xf32>
    %290 = arith.mulf %289, %288 : vector<1x256xf32>
    %291 = arith.addf %287, %290 : vector<1x256xf32>
    %cst_103 = arith.constant 0.000000e+00 : f32
    %292 = vector.broadcast %cst_103 : f32 to vector<1x256xf32>
    %293 = arith.select %47, %291, %292 : vector<1x256xi1>, vector<1x256xf32>
    %294 = arith.addf %282, %293 : vector<1x256xf32>
    %c21 = arith.constant 21 : index
    %295 = memref.load %arg1[%c21] : memref<98xf32, #tpu.memory_space<smem>>
    %c70 = arith.constant 70 : index
    %296 = memref.load %arg1[%c70] : memref<98xf32, #tpu.memory_space<smem>>
    %c0_104 = arith.constant 0 : index
    %c125 = arith.constant 125 : index
    %297 = vector.load %arg4[%c0_104, %c125] : memref<1x512xf32, #tpu.memory_space<vmem>>, vector<1x256xf32>
    %298 = vector.broadcast %295 : f32 to vector<1x256xf32>
    %299 = arith.mulf %298, %297 : vector<1x256xf32>
    %c0_105 = arith.constant 0 : index
    %c125_106 = arith.constant 125 : index
    %300 = vector.load %arg5[%c0_105, %c125_106] : memref<1x512xf32, #tpu.memory_space<vmem>>, vector<1x256xf32>
    %301 = vector.broadcast %296 : f32 to vector<1x256xf32>
    %302 = arith.mulf %301, %300 : vector<1x256xf32>
    %303 = arith.addf %299, %302 : vector<1x256xf32>
    %cst_107 = arith.constant 0.000000e+00 : f32
    %304 = vector.broadcast %cst_107 : f32 to vector<1x256xf32>
    %305 = arith.select %37, %303, %304 : vector<1x256xi1>, vector<1x256xf32>
    %306 = arith.addf %294, %305 : vector<1x256xf32>
    %c22 = arith.constant 22 : index
    %307 = memref.load %arg1[%c22] : memref<98xf32, #tpu.memory_space<smem>>
    %c71 = arith.constant 71 : index
    %308 = memref.load %arg1[%c71] : memref<98xf32, #tpu.memory_space<smem>>
    %c0_108 = arith.constant 0 : index
    %c126 = arith.constant 126 : index
    %309 = vector.load %arg4[%c0_108, %c126] : memref<1x512xf32, #tpu.memory_space<vmem>>, vector<1x256xf32>
    %310 = vector.broadcast %307 : f32 to vector<1x256xf32>
    %311 = arith.mulf %310, %309 : vector<1x256xf32>
    %c0_109 = arith.constant 0 : index
    %c126_110 = arith.constant 126 : index
    %312 = vector.load %arg5[%c0_109, %c126_110] : memref<1x512xf32, #tpu.memory_space<vmem>>, vector<1x256xf32>
    %313 = vector.broadcast %308 : f32 to vector<1x256xf32>
    %314 = arith.mulf %313, %312 : vector<1x256xf32>
    %315 = arith.addf %311, %314 : vector<1x256xf32>
    %cst_111 = arith.constant 0.000000e+00 : f32
    %316 = vector.broadcast %cst_111 : f32 to vector<1x256xf32>
    %317 = arith.select %39, %315, %316 : vector<1x256xi1>, vector<1x256xf32>
    %318 = arith.addf %306, %317 : vector<1x256xf32>
    %c23 = arith.constant 23 : index
    %319 = memref.load %arg1[%c23] : memref<98xf32, #tpu.memory_space<smem>>
    %c72 = arith.constant 72 : index
    %320 = memref.load %arg1[%c72] : memref<98xf32, #tpu.memory_space<smem>>
    %c0_112 = arith.constant 0 : index
    %c127 = arith.constant 127 : index
    %321 = vector.load %arg4[%c0_112, %c127] : memref<1x512xf32, #tpu.memory_space<vmem>>, vector<1x256xf32>
    %322 = vector.broadcast %319 : f32 to vector<1x256xf32>
    %323 = arith.mulf %322, %321 : vector<1x256xf32>
    %c0_113 = arith.constant 0 : index
    %c127_114 = arith.constant 127 : index
    %324 = vector.load %arg5[%c0_113, %c127_114] : memref<1x512xf32, #tpu.memory_space<vmem>>, vector<1x256xf32>
    %325 = vector.broadcast %320 : f32 to vector<1x256xf32>
    %326 = arith.mulf %325, %324 : vector<1x256xf32>
    %327 = arith.addf %323, %326 : vector<1x256xf32>
    %cst_115 = arith.constant 0.000000e+00 : f32
    %328 = vector.broadcast %cst_115 : f32 to vector<1x256xf32>
    %329 = arith.select %41, %327, %328 : vector<1x256xi1>, vector<1x256xf32>
    %330 = arith.addf %318, %329 : vector<1x256xf32>
    %c24 = arith.constant 24 : index
    %331 = memref.load %arg1[%c24] : memref<98xf32, #tpu.memory_space<smem>>
    %c73 = arith.constant 73 : index
    %332 = memref.load %arg1[%c73] : memref<98xf32, #tpu.memory_space<smem>>
    %c0_116 = arith.constant 0 : index
    %c128_117 = arith.constant 128 : index
    %333 = vector.load %arg4[%c0_116, %c128_117] : memref<1x512xf32, #tpu.memory_space<vmem>>, vector<1x256xf32>
    %334 = vector.broadcast %331 : f32 to vector<1x256xf32>
    %335 = arith.mulf %334, %333 : vector<1x256xf32>
    %c0_118 = arith.constant 0 : index
    %c128_119 = arith.constant 128 : index
    %336 = vector.load %arg5[%c0_118, %c128_119] : memref<1x512xf32, #tpu.memory_space<vmem>>, vector<1x256xf32>
    %337 = vector.broadcast %332 : f32 to vector<1x256xf32>
    %338 = arith.mulf %337, %336 : vector<1x256xf32>
    %339 = arith.addf %335, %338 : vector<1x256xf32>
    %340 = arith.addf %330, %339 : vector<1x256xf32>
    %c25 = arith.constant 25 : index
    %341 = memref.load %arg1[%c25] : memref<98xf32, #tpu.memory_space<smem>>
    %c74 = arith.constant 74 : index
    %342 = memref.load %arg1[%c74] : memref<98xf32, #tpu.memory_space<smem>>
    %c0_120 = arith.constant 0 : index
    %c129 = arith.constant 129 : index
    %343 = vector.load %arg4[%c0_120, %c129] : memref<1x512xf32, #tpu.memory_space<vmem>>, vector<1x256xf32>
    %344 = vector.broadcast %341 : f32 to vector<1x256xf32>
    %345 = arith.mulf %344, %343 : vector<1x256xf32>
    %c0_121 = arith.constant 0 : index
    %c129_122 = arith.constant 129 : index
    %346 = vector.load %arg5[%c0_121, %c129_122] : memref<1x512xf32, #tpu.memory_space<vmem>>, vector<1x256xf32>
    %347 = vector.broadcast %342 : f32 to vector<1x256xf32>
    %348 = arith.mulf %347, %346 : vector<1x256xf32>
    %349 = arith.addf %345, %348 : vector<1x256xf32>
    %cst_123 = arith.constant 0.000000e+00 : f32
    %350 = vector.broadcast %cst_123 : f32 to vector<1x256xf32>
    %351 = arith.select %43, %349, %350 : vector<1x256xi1>, vector<1x256xf32>
    %352 = arith.addf %340, %351 : vector<1x256xf32>
    %c26 = arith.constant 26 : index
    %353 = memref.load %arg1[%c26] : memref<98xf32, #tpu.memory_space<smem>>
    %c75 = arith.constant 75 : index
    %354 = memref.load %arg1[%c75] : memref<98xf32, #tpu.memory_space<smem>>
    %c0_124 = arith.constant 0 : index
    %c130 = arith.constant 130 : index
    %355 = vector.load %arg4[%c0_124, %c130] : memref<1x512xf32, #tpu.memory_space<vmem>>, vector<1x256xf32>
    %356 = vector.broadcast %353 : f32 to vector<1x256xf32>
    %357 = arith.mulf %356, %355 : vector<1x256xf32>
    %c0_125 = arith.constant 0 : index
    %c130_126 = arith.constant 130 : index
    %358 = vector.load %arg5[%c0_125, %c130_126] : memref<1x512xf32, #tpu.memory_space<vmem>>, vector<1x256xf32>
    %359 = vector.broadcast %354 : f32 to vector<1x256xf32>
    %360 = arith.mulf %359, %358 : vector<1x256xf32>
    %361 = arith.addf %357, %360 : vector<1x256xf32>
    %cst_127 = arith.constant 0.000000e+00 : f32
    %362 = vector.broadcast %cst_127 : f32 to vector<1x256xf32>
    %363 = arith.select %45, %361, %362 : vector<1x256xi1>, vector<1x256xf32>
    %364 = arith.addf %352, %363 : vector<1x256xf32>
    %c27 = arith.constant 27 : index
    %365 = memref.load %arg1[%c27] : memref<98xf32, #tpu.memory_space<smem>>
    %c76 = arith.constant 76 : index
    %366 = memref.load %arg1[%c76] : memref<98xf32, #tpu.memory_space<smem>>
    %c0_128 = arith.constant 0 : index
    %c131 = arith.constant 131 : index
    %367 = vector.load %arg4[%c0_128, %c131] : memref<1x512xf32, #tpu.memory_space<vmem>>, vector<1x256xf32>
    %368 = vector.broadcast %365 : f32 to vector<1x256xf32>
    %369 = arith.mulf %368, %367 : vector<1x256xf32>
    %c0_129 = arith.constant 0 : index
    %c131_130 = arith.constant 131 : index
    %370 = vector.load %arg5[%c0_129, %c131_130] : memref<1x512xf32, #tpu.memory_space<vmem>>, vector<1x256xf32>
    %371 = vector.broadcast %366 : f32 to vector<1x256xf32>
    %372 = arith.mulf %371, %370 : vector<1x256xf32>
    %373 = arith.addf %369, %372 : vector<1x256xf32>
    %cst_131 = arith.constant 0.000000e+00 : f32
    %374 = vector.broadcast %cst_131 : f32 to vector<1x256xf32>
    %375 = arith.select %47, %373, %374 : vector<1x256xi1>, vector<1x256xf32>
    %376 = arith.addf %364, %375 : vector<1x256xf32>
    %c28 = arith.constant 28 : index
    %377 = memref.load %arg1[%c28] : memref<98xf32, #tpu.memory_space<smem>>
    %c77_132 = arith.constant 77 : index
    %378 = memref.load %arg1[%c77_132] : memref<98xf32, #tpu.memory_space<smem>>
    %c0_133 = arith.constant 0 : index
    %c141 = arith.constant 141 : index
    %379 = vector.load %arg4[%c0_133, %c141] : memref<1x512xf32, #tpu.memory_space<vmem>>, vector<1x256xf32>
    %380 = vector.broadcast %377 : f32 to vector<1x256xf32>
    %381 = arith.mulf %380, %379 : vector<1x256xf32>
    %c0_134 = arith.constant 0 : index
    %c141_135 = arith.constant 141 : index
    %382 = vector.load %arg5[%c0_134, %c141_135] : memref<1x512xf32, #tpu.memory_space<vmem>>, vector<1x256xf32>
    %383 = vector.broadcast %378 : f32 to vector<1x256xf32>
    %384 = arith.mulf %383, %382 : vector<1x256xf32>
    %385 = arith.addf %381, %384 : vector<1x256xf32>
    %cst_136 = arith.constant 0.000000e+00 : f32
    %386 = vector.broadcast %cst_136 : f32 to vector<1x256xf32>
    %387 = arith.select %37, %385, %386 : vector<1x256xi1>, vector<1x256xf32>
    %388 = arith.addf %376, %387 : vector<1x256xf32>
    %c29 = arith.constant 29 : index
    %389 = memref.load %arg1[%c29] : memref<98xf32, #tpu.memory_space<smem>>
    %c78_137 = arith.constant 78 : index
    %390 = memref.load %arg1[%c78_137] : memref<98xf32, #tpu.memory_space<smem>>
    %c0_138 = arith.constant 0 : index
    %c142 = arith.constant 142 : index
    %391 = vector.load %arg4[%c0_138, %c142] : memref<1x512xf32, #tpu.memory_space<vmem>>, vector<1x256xf32>
    %392 = vector.broadcast %389 : f32 to vector<1x256xf32>
    %393 = arith.mulf %392, %391 : vector<1x256xf32>
    %c0_139 = arith.constant 0 : index
    %c142_140 = arith.constant 142 : index
    %394 = vector.load %arg5[%c0_139, %c142_140] : memref<1x512xf32, #tpu.memory_space<vmem>>, vector<1x256xf32>
    %395 = vector.broadcast %390 : f32 to vector<1x256xf32>
    %396 = arith.mulf %395, %394 : vector<1x256xf32>
    %397 = arith.addf %393, %396 : vector<1x256xf32>
    %cst_141 = arith.constant 0.000000e+00 : f32
    %398 = vector.broadcast %cst_141 : f32 to vector<1x256xf32>
    %399 = arith.select %39, %397, %398 : vector<1x256xi1>, vector<1x256xf32>
    %400 = arith.addf %388, %399 : vector<1x256xf32>
    %c30 = arith.constant 30 : index
    %401 = memref.load %arg1[%c30] : memref<98xf32, #tpu.memory_space<smem>>
    %c79_142 = arith.constant 79 : index
    %402 = memref.load %arg1[%c79_142] : memref<98xf32, #tpu.memory_space<smem>>
    %c0_143 = arith.constant 0 : index
    %c143 = arith.constant 143 : index
    %403 = vector.load %arg4[%c0_143, %c143] : memref<1x512xf32, #tpu.memory_space<vmem>>, vector<1x256xf32>
    %404 = vector.broadcast %401 : f32 to vector<1x256xf32>
    %405 = arith.mulf %404, %403 : vector<1x256xf32>
    %c0_144 = arith.constant 0 : index
    %c143_145 = arith.constant 143 : index
    %406 = vector.load %arg5[%c0_144, %c143_145] : memref<1x512xf32, #tpu.memory_space<vmem>>, vector<1x256xf32>
    %407 = vector.broadcast %402 : f32 to vector<1x256xf32>
    %408 = arith.mulf %407, %406 : vector<1x256xf32>
    %409 = arith.addf %405, %408 : vector<1x256xf32>
    %cst_146 = arith.constant 0.000000e+00 : f32
    %410 = vector.broadcast %cst_146 : f32 to vector<1x256xf32>
    %411 = arith.select %41, %409, %410 : vector<1x256xi1>, vector<1x256xf32>
    %412 = arith.addf %400, %411 : vector<1x256xf32>
    %c31 = arith.constant 31 : index
    %413 = memref.load %arg1[%c31] : memref<98xf32, #tpu.memory_space<smem>>
    %c80_147 = arith.constant 80 : index
    %414 = memref.load %arg1[%c80_147] : memref<98xf32, #tpu.memory_space<smem>>
    %c0_148 = arith.constant 0 : index
    %c144 = arith.constant 144 : index
    %415 = vector.load %arg4[%c0_148, %c144] : memref<1x512xf32, #tpu.memory_space<vmem>>, vector<1x256xf32>
    %416 = vector.broadcast %413 : f32 to vector<1x256xf32>
    %417 = arith.mulf %416, %415 : vector<1x256xf32>
    %c0_149 = arith.constant 0 : index
    %c144_150 = arith.constant 144 : index
    %418 = vector.load %arg5[%c0_149, %c144_150] : memref<1x512xf32, #tpu.memory_space<vmem>>, vector<1x256xf32>
    %419 = vector.broadcast %414 : f32 to vector<1x256xf32>
    %420 = arith.mulf %419, %418 : vector<1x256xf32>
    %421 = arith.addf %417, %420 : vector<1x256xf32>
    %422 = arith.addf %412, %421 : vector<1x256xf32>
    %c32 = arith.constant 32 : index
    %423 = memref.load %arg1[%c32] : memref<98xf32, #tpu.memory_space<smem>>
    %c81_151 = arith.constant 81 : index
    %424 = memref.load %arg1[%c81_151] : memref<98xf32, #tpu.memory_space<smem>>
    %c0_152 = arith.constant 0 : index
    %c145 = arith.constant 145 : index
    %425 = vector.load %arg4[%c0_152, %c145] : memref<1x512xf32, #tpu.memory_space<vmem>>, vector<1x256xf32>
    %426 = vector.broadcast %423 : f32 to vector<1x256xf32>
    %427 = arith.mulf %426, %425 : vector<1x256xf32>
    %c0_153 = arith.constant 0 : index
    %c145_154 = arith.constant 145 : index
    %428 = vector.load %arg5[%c0_153, %c145_154] : memref<1x512xf32, #tpu.memory_space<vmem>>, vector<1x256xf32>
    %429 = vector.broadcast %424 : f32 to vector<1x256xf32>
    %430 = arith.mulf %429, %428 : vector<1x256xf32>
    %431 = arith.addf %427, %430 : vector<1x256xf32>
    %cst_155 = arith.constant 0.000000e+00 : f32
    %432 = vector.broadcast %cst_155 : f32 to vector<1x256xf32>
    %433 = arith.select %43, %431, %432 : vector<1x256xi1>, vector<1x256xf32>
    %434 = arith.addf %422, %433 : vector<1x256xf32>
    %c33 = arith.constant 33 : index
    %435 = memref.load %arg1[%c33] : memref<98xf32, #tpu.memory_space<smem>>
    %c82_156 = arith.constant 82 : index
    %436 = memref.load %arg1[%c82_156] : memref<98xf32, #tpu.memory_space<smem>>
    %c0_157 = arith.constant 0 : index
    %c146 = arith.constant 146 : index
    %437 = vector.load %arg4[%c0_157, %c146] : memref<1x512xf32, #tpu.memory_space<vmem>>, vector<1x256xf32>
    %438 = vector.broadcast %435 : f32 to vector<1x256xf32>
    %439 = arith.mulf %438, %437 : vector<1x256xf32>
    %c0_158 = arith.constant 0 : index
    %c146_159 = arith.constant 146 : index
    %440 = vector.load %arg5[%c0_158, %c146_159] : memref<1x512xf32, #tpu.memory_space<vmem>>, vector<1x256xf32>
    %441 = vector.broadcast %436 : f32 to vector<1x256xf32>
    %442 = arith.mulf %441, %440 : vector<1x256xf32>
    %443 = arith.addf %439, %442 : vector<1x256xf32>
    %cst_160 = arith.constant 0.000000e+00 : f32
    %444 = vector.broadcast %cst_160 : f32 to vector<1x256xf32>
    %445 = arith.select %45, %443, %444 : vector<1x256xi1>, vector<1x256xf32>
    %446 = arith.addf %434, %445 : vector<1x256xf32>
    %c34 = arith.constant 34 : index
    %447 = memref.load %arg1[%c34] : memref<98xf32, #tpu.memory_space<smem>>
    %c83_161 = arith.constant 83 : index
    %448 = memref.load %arg1[%c83_161] : memref<98xf32, #tpu.memory_space<smem>>
    %c0_162 = arith.constant 0 : index
    %c147 = arith.constant 147 : index
    %449 = vector.load %arg4[%c0_162, %c147] : memref<1x512xf32, #tpu.memory_space<vmem>>, vector<1x256xf32>
    %450 = vector.broadcast %447 : f32 to vector<1x256xf32>
    %451 = arith.mulf %450, %449 : vector<1x256xf32>
    %c0_163 = arith.constant 0 : index
    %c147_164 = arith.constant 147 : index
    %452 = vector.load %arg5[%c0_163, %c147_164] : memref<1x512xf32, #tpu.memory_space<vmem>>, vector<1x256xf32>
    %453 = vector.broadcast %448 : f32 to vector<1x256xf32>
    %454 = arith.mulf %453, %452 : vector<1x256xf32>
    %455 = arith.addf %451, %454 : vector<1x256xf32>
    %cst_165 = arith.constant 0.000000e+00 : f32
    %456 = vector.broadcast %cst_165 : f32 to vector<1x256xf32>
    %457 = arith.select %47, %455, %456 : vector<1x256xi1>, vector<1x256xf32>
    %458 = arith.addf %446, %457 : vector<1x256xf32>
    %c35 = arith.constant 35 : index
    %459 = memref.load %arg1[%c35] : memref<98xf32, #tpu.memory_space<smem>>
    %c84 = arith.constant 84 : index
    %460 = memref.load %arg1[%c84] : memref<98xf32, #tpu.memory_space<smem>>
    %c0_166 = arith.constant 0 : index
    %c157 = arith.constant 157 : index
    %461 = vector.load %arg4[%c0_166, %c157] : memref<1x512xf32, #tpu.memory_space<vmem>>, vector<1x256xf32>
    %462 = vector.broadcast %459 : f32 to vector<1x256xf32>
    %463 = arith.mulf %462, %461 : vector<1x256xf32>
    %c0_167 = arith.constant 0 : index
    %c157_168 = arith.constant 157 : index
    %464 = vector.load %arg5[%c0_167, %c157_168] : memref<1x512xf32, #tpu.memory_space<vmem>>, vector<1x256xf32>
    %465 = vector.broadcast %460 : f32 to vector<1x256xf32>
    %466 = arith.mulf %465, %464 : vector<1x256xf32>
    %467 = arith.addf %463, %466 : vector<1x256xf32>
    %cst_169 = arith.constant 0.000000e+00 : f32
    %468 = vector.broadcast %cst_169 : f32 to vector<1x256xf32>
    %469 = arith.select %37, %467, %468 : vector<1x256xi1>, vector<1x256xf32>
    %470 = arith.addf %458, %469 : vector<1x256xf32>
    %c36 = arith.constant 36 : index
    %471 = memref.load %arg1[%c36] : memref<98xf32, #tpu.memory_space<smem>>
    %c85 = arith.constant 85 : index
    %472 = memref.load %arg1[%c85] : memref<98xf32, #tpu.memory_space<smem>>
    %c0_170 = arith.constant 0 : index
    %c158 = arith.constant 158 : index
    %473 = vector.load %arg4[%c0_170, %c158] : memref<1x512xf32, #tpu.memory_space<vmem>>, vector<1x256xf32>
    %474 = vector.broadcast %471 : f32 to vector<1x256xf32>
    %475 = arith.mulf %474, %473 : vector<1x256xf32>
    %c0_171 = arith.constant 0 : index
    %c158_172 = arith.constant 158 : index
    %476 = vector.load %arg5[%c0_171, %c158_172] : memref<1x512xf32, #tpu.memory_space<vmem>>, vector<1x256xf32>
    %477 = vector.broadcast %472 : f32 to vector<1x256xf32>
    %478 = arith.mulf %477, %476 : vector<1x256xf32>
    %479 = arith.addf %475, %478 : vector<1x256xf32>
    %cst_173 = arith.constant 0.000000e+00 : f32
    %480 = vector.broadcast %cst_173 : f32 to vector<1x256xf32>
    %481 = arith.select %39, %479, %480 : vector<1x256xi1>, vector<1x256xf32>
    %482 = arith.addf %470, %481 : vector<1x256xf32>
    %c37 = arith.constant 37 : index
    %483 = memref.load %arg1[%c37] : memref<98xf32, #tpu.memory_space<smem>>
    %c86 = arith.constant 86 : index
    %484 = memref.load %arg1[%c86] : memref<98xf32, #tpu.memory_space<smem>>
    %c0_174 = arith.constant 0 : index
    %c159 = arith.constant 159 : index
    %485 = vector.load %arg4[%c0_174, %c159] : memref<1x512xf32, #tpu.memory_space<vmem>>, vector<1x256xf32>
    %486 = vector.broadcast %483 : f32 to vector<1x256xf32>
    %487 = arith.mulf %486, %485 : vector<1x256xf32>
    %c0_175 = arith.constant 0 : index
    %c159_176 = arith.constant 159 : index
    %488 = vector.load %arg5[%c0_175, %c159_176] : memref<1x512xf32, #tpu.memory_space<vmem>>, vector<1x256xf32>
    %489 = vector.broadcast %484 : f32 to vector<1x256xf32>
    %490 = arith.mulf %489, %488 : vector<1x256xf32>
    %491 = arith.addf %487, %490 : vector<1x256xf32>
    %cst_177 = arith.constant 0.000000e+00 : f32
    %492 = vector.broadcast %cst_177 : f32 to vector<1x256xf32>
    %493 = arith.select %41, %491, %492 : vector<1x256xi1>, vector<1x256xf32>
    %494 = arith.addf %482, %493 : vector<1x256xf32>
    %c38 = arith.constant 38 : index
    %495 = memref.load %arg1[%c38] : memref<98xf32, #tpu.memory_space<smem>>
    %c87 = arith.constant 87 : index
    %496 = memref.load %arg1[%c87] : memref<98xf32, #tpu.memory_space<smem>>
    %c0_178 = arith.constant 0 : index
    %c160 = arith.constant 160 : index
    %497 = vector.load %arg4[%c0_178, %c160] : memref<1x512xf32, #tpu.memory_space<vmem>>, vector<1x256xf32>
    %498 = vector.broadcast %495 : f32 to vector<1x256xf32>
    %499 = arith.mulf %498, %497 : vector<1x256xf32>
    %c0_179 = arith.constant 0 : index
    %c160_180 = arith.constant 160 : index
    %500 = vector.load %arg5[%c0_179, %c160_180] : memref<1x512xf32, #tpu.memory_space<vmem>>, vector<1x256xf32>
    %501 = vector.broadcast %496 : f32 to vector<1x256xf32>
    %502 = arith.mulf %501, %500 : vector<1x256xf32>
    %503 = arith.addf %499, %502 : vector<1x256xf32>
    %504 = arith.addf %494, %503 : vector<1x256xf32>
    %c39 = arith.constant 39 : index
    %505 = memref.load %arg1[%c39] : memref<98xf32, #tpu.memory_space<smem>>
    %c88 = arith.constant 88 : index
    %506 = memref.load %arg1[%c88] : memref<98xf32, #tpu.memory_space<smem>>
    %c0_181 = arith.constant 0 : index
    %c161 = arith.constant 161 : index
    %507 = vector.load %arg4[%c0_181, %c161] : memref<1x512xf32, #tpu.memory_space<vmem>>, vector<1x256xf32>
    %508 = vector.broadcast %505 : f32 to vector<1x256xf32>
    %509 = arith.mulf %508, %507 : vector<1x256xf32>
    %c0_182 = arith.constant 0 : index
    %c161_183 = arith.constant 161 : index
    %510 = vector.load %arg5[%c0_182, %c161_183] : memref<1x512xf32, #tpu.memory_space<vmem>>, vector<1x256xf32>
    %511 = vector.broadcast %506 : f32 to vector<1x256xf32>
    %512 = arith.mulf %511, %510 : vector<1x256xf32>
    %513 = arith.addf %509, %512 : vector<1x256xf32>
    %cst_184 = arith.constant 0.000000e+00 : f32
    %514 = vector.broadcast %cst_184 : f32 to vector<1x256xf32>
    %515 = arith.select %43, %513, %514 : vector<1x256xi1>, vector<1x256xf32>
    %516 = arith.addf %504, %515 : vector<1x256xf32>
    %c40 = arith.constant 40 : index
    %517 = memref.load %arg1[%c40] : memref<98xf32, #tpu.memory_space<smem>>
    %c89 = arith.constant 89 : index
    %518 = memref.load %arg1[%c89] : memref<98xf32, #tpu.memory_space<smem>>
    %c0_185 = arith.constant 0 : index
    %c162 = arith.constant 162 : index
    %519 = vector.load %arg4[%c0_185, %c162] : memref<1x512xf32, #tpu.memory_space<vmem>>, vector<1x256xf32>
    %520 = vector.broadcast %517 : f32 to vector<1x256xf32>
    %521 = arith.mulf %520, %519 : vector<1x256xf32>
    %c0_186 = arith.constant 0 : index
    %c162_187 = arith.constant 162 : index
    %522 = vector.load %arg5[%c0_186, %c162_187] : memref<1x512xf32, #tpu.memory_space<vmem>>, vector<1x256xf32>
    %523 = vector.broadcast %518 : f32 to vector<1x256xf32>
    %524 = arith.mulf %523, %522 : vector<1x256xf32>
    %525 = arith.addf %521, %524 : vector<1x256xf32>
    %cst_188 = arith.constant 0.000000e+00 : f32
    %526 = vector.broadcast %cst_188 : f32 to vector<1x256xf32>
    %527 = arith.select %45, %525, %526 : vector<1x256xi1>, vector<1x256xf32>
    %528 = arith.addf %516, %527 : vector<1x256xf32>
    %c41 = arith.constant 41 : index
    %529 = memref.load %arg1[%c41] : memref<98xf32, #tpu.memory_space<smem>>
    %c90 = arith.constant 90 : index
    %530 = memref.load %arg1[%c90] : memref<98xf32, #tpu.memory_space<smem>>
    %c0_189 = arith.constant 0 : index
    %c163 = arith.constant 163 : index
    %531 = vector.load %arg4[%c0_189, %c163] : memref<1x512xf32, #tpu.memory_space<vmem>>, vector<1x256xf32>
    %532 = vector.broadcast %529 : f32 to vector<1x256xf32>
    %533 = arith.mulf %532, %531 : vector<1x256xf32>
    %c0_190 = arith.constant 0 : index
    %c163_191 = arith.constant 163 : index
    %534 = vector.load %arg5[%c0_190, %c163_191] : memref<1x512xf32, #tpu.memory_space<vmem>>, vector<1x256xf32>
    %535 = vector.broadcast %530 : f32 to vector<1x256xf32>
    %536 = arith.mulf %535, %534 : vector<1x256xf32>
    %537 = arith.addf %533, %536 : vector<1x256xf32>
    %cst_192 = arith.constant 0.000000e+00 : f32
    %538 = vector.broadcast %cst_192 : f32 to vector<1x256xf32>
    %539 = arith.select %47, %537, %538 : vector<1x256xi1>, vector<1x256xf32>
    %540 = arith.addf %528, %539 : vector<1x256xf32>
    %c42 = arith.constant 42 : index
    %541 = memref.load %arg1[%c42] : memref<98xf32, #tpu.memory_space<smem>>
    %c91 = arith.constant 91 : index
    %542 = memref.load %arg1[%c91] : memref<98xf32, #tpu.memory_space<smem>>
    %c0_193 = arith.constant 0 : index
    %c173 = arith.constant 173 : index
    %543 = vector.load %arg4[%c0_193, %c173] : memref<1x512xf32, #tpu.memory_space<vmem>>, vector<1x256xf32>
    %544 = vector.broadcast %541 : f32 to vector<1x256xf32>
    %545 = arith.mulf %544, %543 : vector<1x256xf32>
    %c0_194 = arith.constant 0 : index
    %c173_195 = arith.constant 173 : index
    %546 = vector.load %arg5[%c0_194, %c173_195] : memref<1x512xf32, #tpu.memory_space<vmem>>, vector<1x256xf32>
    %547 = vector.broadcast %542 : f32 to vector<1x256xf32>
    %548 = arith.mulf %547, %546 : vector<1x256xf32>
    %549 = arith.addf %545, %548 : vector<1x256xf32>
    %cst_196 = arith.constant 0.000000e+00 : f32
    %550 = vector.broadcast %cst_196 : f32 to vector<1x256xf32>
    %551 = arith.select %37, %549, %550 : vector<1x256xi1>, vector<1x256xf32>
    %552 = arith.addf %540, %551 : vector<1x256xf32>
    %c43 = arith.constant 43 : index
    %553 = memref.load %arg1[%c43] : memref<98xf32, #tpu.memory_space<smem>>
    %c92 = arith.constant 92 : index
    %554 = memref.load %arg1[%c92] : memref<98xf32, #tpu.memory_space<smem>>
    %c0_197 = arith.constant 0 : index
    %c174 = arith.constant 174 : index
    %555 = vector.load %arg4[%c0_197, %c174] : memref<1x512xf32, #tpu.memory_space<vmem>>, vector<1x256xf32>
    %556 = vector.broadcast %553 : f32 to vector<1x256xf32>
    %557 = arith.mulf %556, %555 : vector<1x256xf32>
    %c0_198 = arith.constant 0 : index
    %c174_199 = arith.constant 174 : index
    %558 = vector.load %arg5[%c0_198, %c174_199] : memref<1x512xf32, #tpu.memory_space<vmem>>, vector<1x256xf32>
    %559 = vector.broadcast %554 : f32 to vector<1x256xf32>
    %560 = arith.mulf %559, %558 : vector<1x256xf32>
    %561 = arith.addf %557, %560 : vector<1x256xf32>
    %cst_200 = arith.constant 0.000000e+00 : f32
    %562 = vector.broadcast %cst_200 : f32 to vector<1x256xf32>
    %563 = arith.select %39, %561, %562 : vector<1x256xi1>, vector<1x256xf32>
    %564 = arith.addf %552, %563 : vector<1x256xf32>
    %c44 = arith.constant 44 : index
    %565 = memref.load %arg1[%c44] : memref<98xf32, #tpu.memory_space<smem>>
    %c93_201 = arith.constant 93 : index
    %566 = memref.load %arg1[%c93_201] : memref<98xf32, #tpu.memory_space<smem>>
    %c0_202 = arith.constant 0 : index
    %c175 = arith.constant 175 : index
    %567 = vector.load %arg4[%c0_202, %c175] : memref<1x512xf32, #tpu.memory_space<vmem>>, vector<1x256xf32>
    %568 = vector.broadcast %565 : f32 to vector<1x256xf32>
    %569 = arith.mulf %568, %567 : vector<1x256xf32>
    %c0_203 = arith.constant 0 : index
    %c175_204 = arith.constant 175 : index
    %570 = vector.load %arg5[%c0_203, %c175_204] : memref<1x512xf32, #tpu.memory_space<vmem>>, vector<1x256xf32>
    %571 = vector.broadcast %566 : f32 to vector<1x256xf32>
    %572 = arith.mulf %571, %570 : vector<1x256xf32>
    %573 = arith.addf %569, %572 : vector<1x256xf32>
    %cst_205 = arith.constant 0.000000e+00 : f32
    %574 = vector.broadcast %cst_205 : f32 to vector<1x256xf32>
    %575 = arith.select %41, %573, %574 : vector<1x256xi1>, vector<1x256xf32>
    %576 = arith.addf %564, %575 : vector<1x256xf32>
    %c45 = arith.constant 45 : index
    %577 = memref.load %arg1[%c45] : memref<98xf32, #tpu.memory_space<smem>>
    %c94_206 = arith.constant 94 : index
    %578 = memref.load %arg1[%c94_206] : memref<98xf32, #tpu.memory_space<smem>>
    %c0_207 = arith.constant 0 : index
    %c176 = arith.constant 176 : index
    %579 = vector.load %arg4[%c0_207, %c176] : memref<1x512xf32, #tpu.memory_space<vmem>>, vector<1x256xf32>
    %580 = vector.broadcast %577 : f32 to vector<1x256xf32>
    %581 = arith.mulf %580, %579 : vector<1x256xf32>
    %c0_208 = arith.constant 0 : index
    %c176_209 = arith.constant 176 : index
    %582 = vector.load %arg5[%c0_208, %c176_209] : memref<1x512xf32, #tpu.memory_space<vmem>>, vector<1x256xf32>
    %583 = vector.broadcast %578 : f32 to vector<1x256xf32>
    %584 = arith.mulf %583, %582 : vector<1x256xf32>
    %585 = arith.addf %581, %584 : vector<1x256xf32>
    %586 = arith.addf %576, %585 : vector<1x256xf32>
    %c46 = arith.constant 46 : index
    %587 = memref.load %arg1[%c46] : memref<98xf32, #tpu.memory_space<smem>>
    %c95_210 = arith.constant 95 : index
    %588 = memref.load %arg1[%c95_210] : memref<98xf32, #tpu.memory_space<smem>>
    %c0_211 = arith.constant 0 : index
    %c177 = arith.constant 177 : index
    %589 = vector.load %arg4[%c0_211, %c177] : memref<1x512xf32, #tpu.memory_space<vmem>>, vector<1x256xf32>
    %590 = vector.broadcast %587 : f32 to vector<1x256xf32>
    %591 = arith.mulf %590, %589 : vector<1x256xf32>
    %c0_212 = arith.constant 0 : index
    %c177_213 = arith.constant 177 : index
    %592 = vector.load %arg5[%c0_212, %c177_213] : memref<1x512xf32, #tpu.memory_space<vmem>>, vector<1x256xf32>
    %593 = vector.broadcast %588 : f32 to vector<1x256xf32>
    %594 = arith.mulf %593, %592 : vector<1x256xf32>
    %595 = arith.addf %591, %594 : vector<1x256xf32>
    %cst_214 = arith.constant 0.000000e+00 : f32
    %596 = vector.broadcast %cst_214 : f32 to vector<1x256xf32>
    %597 = arith.select %43, %595, %596 : vector<1x256xi1>, vector<1x256xf32>
    %598 = arith.addf %586, %597 : vector<1x256xf32>
    %c47 = arith.constant 47 : index
    %599 = memref.load %arg1[%c47] : memref<98xf32, #tpu.memory_space<smem>>
    %c96_215 = arith.constant 96 : index
    %600 = memref.load %arg1[%c96_215] : memref<98xf32, #tpu.memory_space<smem>>
    %c0_216 = arith.constant 0 : index
    %c178 = arith.constant 178 : index
    %601 = vector.load %arg4[%c0_216, %c178] : memref<1x512xf32, #tpu.memory_space<vmem>>, vector<1x256xf32>
    %602 = vector.broadcast %599 : f32 to vector<1x256xf32>
    %603 = arith.mulf %602, %601 : vector<1x256xf32>
    %c0_217 = arith.constant 0 : index
    %c178_218 = arith.constant 178 : index
    %604 = vector.load %arg5[%c0_217, %c178_218] : memref<1x512xf32, #tpu.memory_space<vmem>>, vector<1x256xf32>
    %605 = vector.broadcast %600 : f32 to vector<1x256xf32>
    %606 = arith.mulf %605, %604 : vector<1x256xf32>
    %607 = arith.addf %603, %606 : vector<1x256xf32>
    %cst_219 = arith.constant 0.000000e+00 : f32
    %608 = vector.broadcast %cst_219 : f32 to vector<1x256xf32>
    %609 = arith.select %45, %607, %608 : vector<1x256xi1>, vector<1x256xf32>
    %610 = arith.addf %598, %609 : vector<1x256xf32>
    %c48 = arith.constant 48 : index
    %611 = memref.load %arg1[%c48] : memref<98xf32, #tpu.memory_space<smem>>
    %c97_220 = arith.constant 97 : index
    %612 = memref.load %arg1[%c97_220] : memref<98xf32, #tpu.memory_space<smem>>
    %c0_221 = arith.constant 0 : index
    %c179 = arith.constant 179 : index
    %613 = vector.load %arg4[%c0_221, %c179] : memref<1x512xf32, #tpu.memory_space<vmem>>, vector<1x256xf32>
    %614 = vector.broadcast %611 : f32 to vector<1x256xf32>
    %615 = arith.mulf %614, %613 : vector<1x256xf32>
    %c0_222 = arith.constant 0 : index
    %c179_223 = arith.constant 179 : index
    %616 = vector.load %arg5[%c0_222, %c179_223] : memref<1x512xf32, #tpu.memory_space<vmem>>, vector<1x256xf32>
    %617 = vector.broadcast %612 : f32 to vector<1x256xf32>
    %618 = arith.mulf %617, %616 : vector<1x256xf32>
    %619 = arith.addf %615, %618 : vector<1x256xf32>
    %cst_224 = arith.constant 0.000000e+00 : f32
    %620 = vector.broadcast %cst_224 : f32 to vector<1x256xf32>
    %621 = arith.select %47, %619, %620 : vector<1x256xi1>, vector<1x256xf32>
    %622 = arith.addf %610, %621 : vector<1x256xf32>
    %623 = arith.negf %622 : vector<1x256xf32>
    %624 = math.exp %623 : vector<1x256xf32>
    %cst_225 = arith.constant 1.000000e+00 : f32
    %625 = vector.broadcast %cst_225 : f32 to vector<1x256xf32>
    %626 = arith.addf %625, %624 : vector<1x256xf32>
    %627 = arith.divf %625, %626 : vector<1x256xf32>
    %c0_226 = arith.constant 0 : index
    %c0_227 = arith.constant 0 : index
    %c0_228 = arith.constant 0 : index
    %628 = vector.load %arg2[%c0_226, %c0_227, %c0_228] : memref<1x4x256xf32, #tpu.memory_space<vmem>>, vector<1x4x256xf32>
    %629 = vector.shape_cast %628 : vector<1x4x256xf32> to vector<4x256xf32>
    %630 = vector.broadcast %627 : vector<1x256xf32> to vector<4x256xf32>
    %631 = arith.mulf %629, %630 : vector<4x256xf32>
    %c0_229 = arith.constant 0 : index
    %c0_230 = arith.constant 0 : index
    %c0_231 = arith.constant 0 : index
    %632 = vector.load %arg3[%c0_229, %c0_230, %c0_231] : memref<1x4x256xf32, #tpu.memory_space<vmem>>, vector<1x4x256xf32>
    %633 = vector.shape_cast %632 : vector<1x4x256xf32> to vector<4x256xf32>
    %634 = vector.shape_cast %631 : vector<4x256xf32> to vector<1x4x256xf32>
    tpu.vector_store %arg3[%c0_229, %c0_230, %c0_231], %634 {strides = array<i32>} : memref<1x4x256xf32, #tpu.memory_space<vmem>>, vector<1x4x256xf32>,
    return
  }
  func.func @transform_0(%arg0: i32) -> i32 {
    %c0_i32 = arith.constant 0 : i32
    %c0_i32_0 = arith.constant 0 : i32
    return %c0_i32 : i32
  }
  func.func @transform_1(%arg0: i32) -> (i32, i32, i32) {
    %c0_i32 = arith.constant 0 : i32
    %c0_i32_0 = arith.constant 0 : i32
    %c0_i32_1 = arith.constant 0 : i32
    return %arg0, %c0_i32, %c0_i32_0 : i32, i32, i32
  }
  func.func @transform_2(%arg0: i32) -> (i32, i32, i32) {
    %c0_i32 = arith.constant 0 : i32
    %c0_i32_0 = arith.constant 0 : i32
    %c0_i32_1 = arith.constant 0 : i32
    return %arg0, %c0_i32, %c0_i32_0 : i32, i32, i32
  }
}

</mosaic_0001>

<bundles_post_ra>
// kernel: spatial_attention.1
= control target key start
LH: loop header
LB: loop body
LE: loop exit
PB: predicated region body
PF: predicated region fallthrough
CT: control target
= control target key end

     0   :  { %7 = vsyncpa [#allocation5], 0  ;;  %s1918_s9 = smov 0   ;;  %s2536_s0 = inlined_call_operand.vmem [shape: f32[98], index: 0, kind: input, shape index: {}]   ;;  %s2537_s1 = inlined_call_operand.vmem [shape: f32[2,4,256], index: 1, kind: input, shape index: {}]   ;;  %s2538_s2 = inlined_call_operand.vmem [shape: f32[2,4,256], index: 2, kind: output, shape index: {}]  }
   0x1 LB: > { %s1634_s10 = sadd.s32 4294967295, %s1851_s9   ;;  %p1636_p0 = scmp.ge.s32.totalorder %s1851_s9, 1  ;;  %s1851_s9 = sphi %s1918_s9, %s13_s9  }
   0x2   : > { %p91_p1 = scmp.lt.s32.totalorder %s1851_s9, 3  ;;  %s103_s13 = sshll.u32 %s2536_s0, 4  ;;  %s104_s13 = int_to_ptr.vmem [resolvable:$true] %s103_s13 }
   0x3   : > { %p1756_p3 = scmp.eq.s32.totalorder %s1634_s10, 0  ;;  %s1853_s14 = smov [#allocation4]  }
   0x4   : > { %p92_p2 = pnand %p1636_p0, %p91_p1 }
   0x6   : > { %p1752_p4 = pneg %p92_p2  ;;  %124 = sbr.rel (%p92_p2) target bundleno = 599 (0x257), region = 28 }
   0x8   : > { %p1753_p5 = pnand %p1756_p3, %p1752_p4 }
   0xa   : > { %1755 = dma.vmem_to_smem (!%p1753_p5), %s104_s13, 16, %s1853_s14, [#allocation5]  }
   0xb   : > { %1846 = dma.done.wait (%p1756_p3), [#allocation5], 16  }
   0xc   : > { %1848 = vsyncadd (%p1756_p3), [#allocation5], 4294967280 }
   0xd   : > { %131 = sfence }
   0xe   : > { %p148_p6 = scmp.lt.s32.totalorder %s1634_s10, 1  ;;  %v158_v0 = vlaneseq  ;;  %v1854_v1 = vmov 0.0   ;;  %vm2539_vm1 = vcmask 1043456   ;;  %vm212_vm2 = vcmask 1040384   ;;  %s263_s19 = sld [smem:[#allocation4]] }
   0xf   : > { %s1645_s20 = sld [smem:[#allocation4 + $0x31]]  ;;  %s1855_s25 = smov 51   ;;  %vm308_vm4 = vcmask 408576   ;;  %vm282_vm5 = vcmask 416768   ;;  %vm334_vm10 = vcmask 400384   ;;  %vm360_vm13 = vcmask 392192  }
  0x10   : > { %s2546_s10 = smov (!%p148_p6, %s1634_s10), 1  ;;  %vm160_vm0 = vcmp.lt.s32.totalorder %v158_v0, 128  ;;  %vm215_vm3 = vcmp.lt.s32.totalorder %v158_v0, 256  ;;  %s1646_s21 = sld [smem:[#allocation4 + $0x1]]  ;;  %vm384_vm14 = vcmask 384000  }
  0x11   : > { %162 = vst.msk [vmem:[#allocation2] sm:$0x1] %vm160_vm0, %v1854_v1  ;;  %s1746_s15 = sshll.u32 %s2546_s10, 3  ;;  %s1647_s22 = sld [smem:[#allocation4 + $0x32]] }
  0x12   : > { %164 = vst.msk [vmem:[#allocation3] sm:$0x1] %vm160_vm0, %v1854_v1  ;;  %s1938_s18 = scalar_lea.vmem %s2537_s1, %s1746_s15  ;;  %s1648_s23 = sld [smem:[#allocation4 + $0x2]] }
  0x13   : > { %163 = vst.msk [vmem:[#allocation2 + $0x3] sm:$0x1] %vm160_vm0, %v1854_v1  ;;  %v166_v2 = vld [vmem:[%s1938_s18] sm:$0xff]  ;;  %s1649_s24 = sld [smem:[#allocation4 + $0x33]]  ;;  %s1856_s27 = smov 50  }
  0x14   : > { %165 = vst.msk [vmem:[#allocation3 + $0x3] sm:$0x1] %vm160_vm0, %v1854_v1  ;;  %v266_v40 = vstv %s263_s19  ;;  %s1650_s26 = sld [smem:[#allocation4 + $0x3]]  ;;  %s1857_s3 = smov 49  }
  0x15   : > { %169 = vst [vmem:[#allocation1] ss:$2 sm:$0xff] %v166_v2  ;;  %v269_v42 = vstv %s1645_s20  ;;  %s1651_s28 = sld [smem:[#allocation4 + $0x34]]  ;;  %s1858_s6 = smov 48  }
  0x16   : > { %v293_v41 = vstv %s1646_s21  ;;  %s1652_s29 = sld [smem:[#allocation4 + $0x4]]  ;;  %s1859_s11 = smov 47  }
  0x17   : > { %v295_v43 = vstv %s1647_s22  ;;  %s1653_s30 = sld [smem:[#allocation4 + $0x35]]  ;;  %s1860_s14 = smov 46  }
  0x18   : > { %v319_v54 = vstv %s1648_s23  ;;  %s1654_s4 = sld [smem:[#allocation4 + $0x5]]  ;;  %s1861_s19 = smov 45  }
  0x19   : > { %v321_v55 = vstv %s1649_s24  ;;  %s1655_s5 = sld [smem:[#allocation4 + $0x36]]  ;;  %s1862_s22 = smov 35  }
  0x1a   : > { %v345_v62 = vstv %s1650_s26  ;;  %s1656_s7 = sld [smem:[#allocation4 + $0x6]] }
  0x1b   : > { %v347_v63 = vstv %s1651_s28  ;;  %s1657_s8 = sld [smem:[#allocation4 + $0x37]]  ;;  %s1864_s28 = smov 33  }
  0x1c   : > { %v170_v3 = vld.sshfl [vmem:[#allocation1] sm:$0xff pattern:$0x75316420]  ;;  %v171_v4 = vld.sshfl [vmem:[#allocation1 + $0x8] sm:$0xff pattern:$0x75316420] }
  0x1d   : > { %v175_v5 = vsel %vm2539_vm1, %v170_v3, 0.0  ;;  %v182_v6 = vsel %vm2539_vm1, %v171_v4, 0.0  ;;  %190 = vst [vmem:[#allocation1] ss:$2 sm:$0xff] %v166_v2  ;;  %s1658_s12 = sld [smem:[#allocation4 + $0x7]] }
  0x1e   : > { %v176_v7 = vrot.slane %v175_v5, 4  ;;  %v183_v8 = vrot.slane %v182_v6, 4  ;;  %s1659_s13 = sld [smem:[#allocation4 + $0x38]] }
  0x1f   : > { %s1660_s16 = sld [smem:[#allocation4 + $0x8]] }
  0x20   : > { %v177_v9 = vadd.f32 %v176_v7, %v175_v5  ;;  %v184_v10 = vadd.f32 %v183_v8, %v182_v6  ;;  %v369_v7 = vstv %s1652_s29  ;;  %v371_v8 = vstv %s1653_s30  ;;  %s1661_s17 = sld [smem:[#allocation4 + $0x39]] }
  0x21   : > { %s1662_s20 = sld [smem:[#allocation4 + $0x9]] }
  0x22   : > { %v178_v11 = vrot.slane %v177_v9, 2  ;;  %v185_v12 = vrot.slane %v184_v10, 2  ;;  %s1663_s21 = sld [smem:[#allocation4 + $0x3a]] }
  0x23   : > { %s1664_s23 = sld [smem:[#allocation4 + $0xa]] }
  0x24   : > { %v179_v13 = vadd.f32 %v178_v11, %v177_v9  ;;  %v186_v14 = vadd.f32 %v185_v12, %v184_v10  ;;  %v191_v15 = vld.sshfl [vmem:[#allocation1] sm:$0xff pattern:$0x75316420]  ;;  %v192_v16 = vld.sshfl [vmem:[#allocation1 + $0x8] sm:$0xff pattern:$0x75316420] }
  0x25   : > { %v195_v17 = vsel %vm2539_vm1, %v191_v15, -inf  ;;  %v202_v18 = vsel %vm2539_vm1, %v192_v16, -inf  ;;  %v395_v15 = vstv %s1654_s4  ;;  %v397_v16 = vstv %s1655_s5  ;;  %s1665_s24 = sld [smem:[#allocation4 + $0x3b]]  ;;  %s1865_s4 = smov 32  }
  0x26   : > { %v180_v19 = vrot.slane %v179_v13, 1  ;;  %v187_v20 = vrot.slane %v186_v14, 1  ;;  %v196_v21 = vrot.slane %v195_v17, 4  ;;  %v203_v22 = vrot.slane %v202_v18, 4  ;;  %s1666_s26 = sld [smem:[#allocation4 + $0xb]] }
  0x27   : > { %s1668_s29 = sld [smem:[#allocation4 + $0xc]]  ;;  %vm1330_vm1 = vcmask 760832  }
  0x28   : > { %v181_v23 = vadd.f32 %v180_v19, %v179_v13  ;;  %v188_v24 = vadd.f32 %v187_v20, %v186_v14  ;;  %v197_v25 = vmax.f32 %v195_v17, %v196_v21  ;;  %v204_v26 = vmax.f32 %v202_v18, %v203_v22  ;;  %s1669_s30 = sld [smem:[#allocation4 + $0x3d]] }
  0x29   : > { %s1671_s5 = sld [smem:[#allocation4 + $0x3e]] }
  0x2a   : > { %v198_v27 = vrot.slane %v197_v25, 2  ;;  %v205_v28 = vrot.slane %v204_v26, 2  ;;  %v211_v29 = vrot.slane %v188_v24, 7  ;;  %v423_v24 = vstv %s1657_s8  ;;  %s1673_s8 = sld [smem:[#allocation4 + $0x3f]] }
  0x2c   : > { %v199_v30 = vmax.f32 %v197_v25, %v198_v27  ;;  %v206_v31 = vmax.f32 %v204_v26, %v205_v28  ;;  %v213_v32 = vsel %vm212_vm2, %v181_v23, %v211_v29  ;;  %v421_v23 = vstv %s1656_s7  ;;  %s1672_s7 = sld [smem:[#allocation4 + $0xe]] }
  0x2d   : > { %217 = vst.msk [vmem:[#allocation2 + $0x1] sm:$0x3] %vm215_vm3, %v213_v32  ;;  %v449_v32 = vstv %s1659_s13  ;;  %s1675_s13 = sld [smem:[#allocation4 + $0x40]] }
  0x2e   : > { %v200_v33 = vrot.slane %v199_v30, 1  ;;  %v207_v34 = vrot.slane %v206_v31, 1 }
  0x30   : > { %v201_v35 = vmax.f32 %v199_v30, %v200_v33  ;;  %v208_v36 = vmax.f32 %v206_v31, %v207_v34  ;;  %v447_v31 = vstv %s1658_s12  ;;  %s1674_s12 = sld [smem:[#allocation4 + $0xf]] }
  0x32   : > { %v220_v37 = vrot.slane %v208_v36, 7 }
  0x34   : > { %v221_v38 = vsel %vm212_vm2, %v201_v35, %v220_v37  ;;  %v1948_v39 = vld [vmem:[#allocation2] sm:$0x7]  ;;  %vm410_vm2 = vcmask 375808  }
  0x35   : > { %223 = vst.msk [vmem:[#allocation3 + $0x1] sm:$0x3] %vm215_vm3, %v221_v38  ;;  %v267_v44 = vmul.f32 %v266_v40, %v1948_v39  ;;  %v294_v46 = vmul.f32 %v293_v41, %v1948_v39  ;;  %v320_v58 = vmul.f32 %v319_v54, %v1948_v39  ;;  %v346_v3 = vmul.f32 %v345_v62, %v1948_v39 }
  0x36   : > { %v370_v11 = vmul.f32 %v369_v7, %v1948_v39  ;;  %v396_v19 = vmul.f32 %v395_v15, %v1948_v39  ;;  %v422_v27 = vmul.f32 %v421_v23, %v1948_v39  ;;  %v448_v35 = vmul.f32 %v447_v31, %v1948_v39 }
  0x37   : > { %v473_v40 = vstv %s1660_s16  ;;  %v475_v41 = vstv %s1661_s17  ;;  %s1677_s16 = sld [smem:[#allocation4 + $0x41]]  ;;  %s1868_s17 = smov 29  }
  0x3c   : > { %v1951_v45 = vld [vmem:[#allocation3] sm:$0x7] }
  0x3d   : > { %v270_v47 = vmul.f32 %v269_v42, %v1951_v45  ;;  %v296_v48 = vmul.f32 %v295_v43, %v1951_v45  ;;  %v322_v59 = vmul.f32 %v321_v55, %v1951_v45  ;;  %v348_v4 = vmul.f32 %v347_v63, %v1951_v45 }
  0x3e   : > { %v372_v12 = vmul.f32 %v371_v8, %v1951_v45  ;;  %v398_v20 = vmul.f32 %v397_v16, %v1951_v45  ;;  %v424_v28 = vmul.f32 %v423_v24, %v1951_v45  ;;  %v450_v36 = vmul.f32 %v449_v32, %v1951_v45 }
  0x3f   : > { %v271_v49 = vadd.f32 %v270_v47, %v267_v44  ;;  %v297_v50 = vadd.f32 %v296_v48, %v294_v46  ;;  %v323_v61 = vadd.f32 %v322_v59, %v320_v58  ;;  %v349_v6 = vadd.f32 %v348_v4, %v346_v3 }
  0x40   : > { %v373_v14 = vadd.f32 %v372_v12, %v370_v11  ;;  %v399_v22 = vadd.f32 %v398_v20, %v396_v19  ;;  %v425_v30 = vadd.f32 %v424_v28, %v422_v27  ;;  %v451_v38 = vadd.f32 %v450_v36, %v448_v35 }
  0x41   : > { %v275_v51 = vperm.slane %v271_v49, 2  ;;  %v273_v52 = vperm.slane %v271_v49, 0  ;;  %v300_v53 = vperm.slane %v297_v50, 1  ;;  %v299_v56 = vperm.slane %v297_v50, 0 }
  0x42   : > { %v274_v57 = vperm.slane %v271_v49, 1  ;;  %v301_v60 = vperm.slane %v297_v50, 2  ;;  %v326_v1 = vperm.slane %v323_v61, 1  ;;  %v325_v2 = vperm.slane %v323_v61, 0 }
  0x43   : > { %280 = vrot.lane.b32.xlu1 %v275_v51, %s1855_s25  ;;  %276 = vrot.lane.b32.xlu0 %v273_v52, %s1855_s25  ;;  %v327_v5 = vperm.slane %v323_v61, 2  ;;  %v352_v9 = vperm.slane %v349_v6, 1  ;;  %v351_v10 = vperm.slane %v349_v6, 0  ;;  %v353_v13 = vperm.slane %v349_v6, 2 }
  0x44   : > { %304 = vrot.lane.b32.xlu2 %v300_v53, %s1856_s27  ;;  %v376_v17 = vperm.slane %v373_v14, 1  ;;  %v375_v18 = vperm.slane %v373_v14, 0  ;;  %v377_v21 = vperm.slane %v373_v14, 2  ;;  %v402_v25 = vperm.slane %v399_v22, 1 }
  0x45   : > { %v401_v26 = vperm.slane %v399_v22, 0  ;;  %v403_v29 = vperm.slane %v399_v22, 2  ;;  %v428_v33 = vperm.slane %v425_v30, 1  ;;  %v427_v34 = vperm.slane %v425_v30, 0 }
  0x46   : > { %v429_v37 = vperm.slane %v425_v30, 2  ;;  %v454_v42 = vperm.slane %v451_v38, 1  ;;  %v453_v43 = vperm.slane %v451_v38, 0  ;;  %v474_v44 = vmul.f32 %v473_v40, %v1948_v39 }
  0x47   : > { %v476_v46 = vmul.f32 %v475_v41, %v1951_v45  ;;  %v455_v47 = vperm.slane %v451_v38, 2  ;;  %v499_v49 = vstv %s1662_s20  ;;  %v501_v50 = vstv %s1663_s21  ;;  %s1869_s20 = smov 19   ;;  %s1993_s21 = sld [smem:[#allocation4 + $0x42]] }
  0x48   : > { %v500_v53 = vmul.f32 %v499_v49, %v1948_v39  ;;  %v502_v54 = vmul.f32 %v501_v50, %v1951_v45  ;;  %v527_v58 = vstv %s1665_s24  ;;  %v577_v11 = vstv %s1669_s30  ;;  %s2011_s24 = sld [smem:[#allocation4 + $0x43]] }
  0x49   : > { %v477_v48 = vadd.f32 %v476_v46, %v474_v44  ;;  %v528_v62 = vmul.f32 %v527_v58, %v1951_v45  ;;  %v578_v15 = vmul.f32 %v577_v11, %v1951_v45  ;;  %v603_v19 = vstv %s1671_s5  ;;  %s2050_s30 = sld [smem:[#allocation4 + $0x45]] }
  0x4a   : > { %v627_v27 = vstv %s1672_s7  ;;  %v629_v28 = vstv %s1673_s8  ;;  %v655_v38 = vstv %s1675_s13  ;;  %v225_v46 = vand.u32 127, %v158_v0  ;;  %s2059_s5 = sld [smem:[#allocation4 + $0x46]] }
  0x4b   : > { %302 = vrot.lane.b32.xlu1 %v299_v56, %s1856_s27  ;;  %278 = vrot.lane.b32.xlu0 %v274_v57, %s1855_s25  ;;  %v480_v51 = vperm.slane %v477_v48, 1  ;;  %v479_v52 = vperm.slane %v477_v48, 0  ;;  %v481_v55 = vperm.slane %v477_v48, 2  ;;  %s1863_s25 = smov 34   ;;  %v503_v56 = vadd.f32 %v502_v54, %v500_v53  ;;  %s2076_s7 = sld [smem:[#allocation4 + $0x16]] }
  0x4c   : > { %306 = vrot.lane.b32.xlu2 %v301_v60, %s1856_s27  ;;  %v525_v57 = vstv %s1664_s23  ;;  %s1667_s27 = sld [smem:[#allocation4 + $0x3c]]  ;;  %v628_v32 = vmul.f32 %v627_v27, %v1948_v39  ;;  %v656_v44 = vmul.f32 %v655_v38, %v1951_v45  ;;  %v681_v49 = vstv %s1677_s16 }
  0x4d   : > { %v506_v59 = vperm.slane %v503_v56, 1  ;;  %v505_v60 = vperm.slane %v503_v56, 0  ;;  %v526_v61 = vmul.f32 %v525_v57, %v1948_v39  ;;  %v507_v63 = vperm.slane %v503_v56, 2  ;;  %s2005_s23 = sld [smem:[#allocation4 + $0x12]] }
  0x4e   : > { %v682_v0 = vmul.f32 %v681_v49, %v1951_v45  ;;  %s2080_s8 = sld [smem:[#allocation4 + $0x47]] }
  0x4f   : > { %s2093_s13 = sld [smem:[#allocation4 + $0x48]] }
  0x50   : > { %s2110_s16 = sld [smem:[#allocation4 + $0x19]] }
  0x52   : > { %v551_v3 = vstv %s1667_s27  ;;  %s2031_s27 = sld [smem:[#allocation4 + $0x44]] }
  0x53   : > { %330 = vrot.lane.b32.xlu1 %v326_v1, %s1857_s3  ;;  %328 = vrot.lane.b32.xlu0 %v325_v2, %s1857_s3  ;;  %v529_v1 = vadd.f32 %v528_v62, %v526_v61  ;;  %v549_v2 = vstv %s1666_s26  ;;  %v552_v7 = vmul.f32 %v551_v3, %v1951_v45  ;;  %s1871_s26 = smov 17  }
  0x54   : > { %332 = vrot.lane.b32.xlu2 %v327_v5, %s1857_s3  ;;  %v550_v6 = vmul.f32 %v549_v2, %v1948_v39  ;;  %s1670_s3 = sld [smem:[#allocation4 + $0xd]] }
  0x55   : > { %v532_v4 = vperm.slane %v529_v1, 1  ;;  %v531_v5 = vperm.slane %v529_v1, 0  ;;  %v533_v8 = vperm.slane %v529_v1, 2 }
  0x5b   : > { %356 = vrot.lane.b32.xlu1 %v352_v9, %s1858_s6  ;;  %354 = vrot.lane.b32.xlu0 %v351_v10, %s1858_s6  ;;  %v553_v9 = vadd.f32 %v552_v7, %v550_v6  ;;  %v575_v10 = vstv %s1668_s29  ;;  %s2048_s29 = sld [smem:[#allocation4 + $0x14]] }
  0x5c   : > { %358 = vrot.lane.b32.xlu2 %v353_v13, %s1858_s6  ;;  %v576_v14 = vmul.f32 %v575_v10, %v1948_v39  ;;  %s1866_s6 = smov 31  }
  0x5d   : > { %v556_v12 = vperm.slane %v553_v9, 1  ;;  %v555_v13 = vperm.slane %v553_v9, 0  ;;  %v557_v16 = vperm.slane %v553_v9, 2 }
  0x63   : > { %380 = vrot.lane.b32.xlu1 %v376_v17, %s1859_s11  ;;  %378 = vrot.lane.b32.xlu0 %v375_v18, %s1859_s11  ;;  %v579_v17 = vadd.f32 %v578_v15, %v576_v14  ;;  %v601_v18 = vstv %s1670_s3  ;;  %s2057_s3 = sld [smem:[#allocation4 + $0x15]] }
  0x64   : > { %382 = vrot.lane.b32.xlu2 %v377_v21, %s1859_s11  ;;  %v602_v20 = vmul.f32 %v601_v18, %v1948_v39  ;;  %v604_v21 = vmul.f32 %v603_v19, %v1951_v45  ;;  %s1867_s11 = smov 30   ;;  %v729_v19 = vstv %s2005_s23  ;;  %s2144_s23 = sld [smem:[#allocation4 + $0x1b]] }
  0x65   : > { %v582_v23 = vperm.slane %v579_v17, 1  ;;  %v581_v24 = vperm.slane %v579_v17, 0 }
  0x6b   : > { %406 = vrot.lane.b32.xlu1 %v402_v25, %s1860_s14  ;;  %404 = vrot.lane.b32.xlu0 %v401_v26, %s1860_s14  ;;  %v583_v25 = vperm.slane %v579_v17, 2  ;;  %v605_v26 = vadd.f32 %v604_v21, %v602_v20  ;;  %v731_v20 = vstv %s2011_s24  ;;  %s2146_s24 = sld [smem:[#allocation4 + $0x4c]] }
  0x6c   : > { %408 = vrot.lane.b32.xlu2 %v403_v29, %s1860_s14  ;;  %s1676_s14 = sld [smem:[#allocation4 + $0x10]] }
  0x6d   : > { %v608_v29 = vperm.slane %v605_v26, 1  ;;  %v607_v31 = vperm.slane %v605_v26, 0  ;;  %v609_v35 = vperm.slane %v605_v26, 2 }
  0x72   : > { %v679_v48 = vstv %s1676_s14  ;;  %s1876_s14 = smov 3  }
  0x73   : > { %432 = vrot.lane.b32.xlu1 %v428_v33, %s1861_s19  ;;  %430 = vrot.lane.b32.xlu0 %v427_v34, %s1861_s19  ;;  %v630_v33 = vmul.f32 %v629_v28, %v1951_v45  ;;  %v680_v54 = vmul.f32 %v679_v48, %v1948_v39 }
  0x74   : > { %434 = vrot.lane.b32.xlu2 %v429_v37, %s1861_s19  ;;  %v653_v37 = vstv %s1674_s12  ;;  %s1991_s19 = sld [smem:[#allocation4 + $0x11]]  ;;  %s1875_s12 = smov 13  }
  0x75   : > { %v631_v36 = vadd.f32 %v630_v33, %v628_v32  ;;  %v683_v61 = vadd.f32 %v682_v0, %v680_v54  ;;  %v783_v54 = vstv %s2050_s30  ;;  %s2172_s30 = sld [smem:[#allocation4 + $0x4e]] }
  0x77   : > { %v634_v41 = vperm.slane %v631_v36, 1  ;;  %v686_v3 = vperm.slane %v683_v61, 1  ;;  %v687_v17 = vperm.slane %v683_v61, 2 }
  0x7a   : > { %v705_v62 = vstv %s1991_s19  ;;  %s2123_s19 = sld [smem:[#allocation4 + $0x1a]] }
  0x7b   : > { %458 = vrot.lane.b32.xlu1 %v454_v42, %s1862_s22  ;;  %456 = vrot.lane.b32.xlu0 %v453_v43, %s1862_s22  ;;  %v633_v42 = vperm.slane %v631_v36, 0  ;;  %v654_v43 = vmul.f32 %v653_v37, %v1948_v39  ;;  %v757_v37 = vstv %s2031_s27  ;;  %s2159_s27 = sld [smem:[#allocation4 + $0x4d]] }
  0x7c   : > { %460 = vrot.lane.b32.xlu2 %v455_v47, %s1862_s22  ;;  %v635_v47 = vperm.slane %v631_v36, 2  ;;  %s1870_s22 = smov 18  }
  0x7d   : > { %v657_v50 = vadd.f32 %v656_v44, %v654_v43  ;;  %v758_v44 = vmul.f32 %v757_v37, %v1951_v45 }
  0x7f   : > { %v660_v56 = vperm.slane %v657_v50, 1  ;;  %v659_v57 = vperm.slane %v657_v50, 0 }
  0x83   : > { %484 = vrot.lane.b32.xlu1 %v480_v51, %s1863_s25  ;;  %482 = vrot.lane.b32.xlu0 %v479_v52, %s1863_s25  ;;  %v226_v51 = vadd.s32 128, %v225_v46 }
  0x84   : > { %486 = vrot.lane.b32.xlu2 %v481_v55, %s1863_s25  ;;  %s2029_s25 = sld [smem:[#allocation4 + $0x13]] }
  0x85   : > { %v1999_v58 = vand.u32 15, %v226_v51 }
  0x87   : > { %vm254_vm6 = vcmp.ge.s32.totalorder %v1999_v58, 2  ;;  %vm252_vm9 = vcmp.ge.s32.totalorder %v1999_v58, 3  ;;  %vm2540_vm11 = vcmp.ge.s32.totalorder %v1999_v58, 1  ;;  %vm258_vm15 = vcmp.lt.s32.totalorder %v1999_v58, 15 }
  0x88   : > { %vm260_vm3 = vcmp.lt.s32.totalorder %v1999_v58, 14 }
  0x8a   : > { %v755_v36 = vstv %s2029_s25  ;;  %s2157_s25 = sld [smem:[#allocation4 + $0x1c]] }
  0x8b   : > { %510 = vrot.lane.b32.xlu1 %v506_v59, %s1864_s28  ;;  %508 = vrot.lane.b32.xlu0 %v505_v60, %s1864_s28  ;;  %v2001_v59 = vand.u32 15, %v225_v46  ;;  %v661_v60 = vperm.slane %v657_v50, 2  ;;  %v756_v43 = vmul.f32 %v755_v36, %v1948_v39 }
  0x8c   : > { %512 = vrot.lane.b32.xlu2 %v507_v63, %s1864_s28  ;;  %v707_v63 = vstv %s1993_s21  ;;  %s1872_s28 = smov 16   ;;  %s2125_s21 = sld [smem:[#allocation4 + $0x4b]] }
  0x8d   : > { %vm253_vm7 = vcmp.ge.s32.totalorder %v2001_v59, 2  ;;  %vm251_vm8 = vcmp.ge.s32.totalorder %v2001_v59, 3  ;;  %v708_v9 = vmul.f32 %v707_v63, %v1951_v45  ;;  %vm2541_vm12 = vcmp.ge.s32.totalorder %v2001_v59, 1 }
  0x8e   : > { %vm257_vm0 = vcmp.lt.s32.totalorder %v2001_v59, 15 }
  0x93   : > { %536 = vrot.lane.b32.xlu1 %v532_v4, %s1865_s4  ;;  %534 = vrot.lane.b32.xlu0 %v531_v5, %s1865_s4  ;;  %v685_v4 = vperm.slane %v683_v61, 0  ;;  %v706_v5 = vmul.f32 %v705_v62, %v1948_v39 }
  0x94   : > { %538 = vrot.lane.b32.xlu2 %v533_v8, %s1865_s4  ;;  %s1873_s4 = smov 15  }
  0x95   : > { %v709_v18 = vadd.f32 %v708_v9, %v706_v5  ;;  %v809_v9 = vstv %s2059_s5  ;;  %s2185_s5 = sld [smem:[#allocation4 + $0x4f]] }
  0x97   : > { %v711_v26 = vperm.slane %v709_v18, 0 }
  0x9b   : > { %560 = vrot.lane.b32.xlu1 %v556_v12, %s1866_s6  ;;  %558 = vrot.lane.b32.xlu0 %v555_v13, %s1866_s6 }
  0x9c   : > { %562 = vrot.lane.b32.xlu2 %v557_v16, %s1866_s6  ;;  %s1874_s6 = smov 14  }
  0x9e   : > { %v1980_v22 = vpop.permute.xlu2 %304 }
  0xa3   : > { %586 = vrot.lane.b32.xlu1 %v582_v23, %s1867_s11  ;;  %584 = vrot.lane.b32.xlu0 %v581_v24, %s1867_s11 }
  0xa4   : > { %588 = vrot.lane.b32.xlu2 %v583_v25, %s1867_s11  ;;  %v712_v25 = vperm.slane %v709_v18, 1  ;;  %s2091_s11 = sld [smem:[#allocation4 + $0x17]] }
  0xa6   : > { %v307_v30 = vpop.permute.xlu2 %306 }
  0xa7   : > { %v310_v34 = vsel %vm308_vm4, %v1980_v22, %v307_v30  ;;  %v730_v30 = vmul.f32 %v729_v19, %v1948_v39 }
  0xa8   : > { %v314_v11 = vsel %vm254_vm6, %v310_v34, 0.0  ;;  %v713_v34 = vperm.slane %v709_v18, 2 }
  0xab   : > { %612 = vrot.lane.b32.xlu1 %v608_v29, %s1868_s17  ;;  %610 = vrot.lane.b32.xlu0 %v607_v31, %s1868_s17  ;;  %v732_v31 = vmul.f32 %v731_v20, %v1951_v45 }
  0xac   : > { %614 = vrot.lane.b32.xlu2 %v609_v35, %s1868_s17  ;;  %s2112_s17 = sld [smem:[#allocation4 + $0x4a]] }
  0xad   : > { %v733_v35 = vadd.f32 %v732_v31, %v730_v30 }
  0xae   : > { %v1986_v40 = vpop.permute.xlu2 %332 }
  0xaf   : > { %v736_v49 = vperm.slane %v733_v35, 1  ;;  %v735_v50 = vperm.slane %v733_v35, 0  ;;  %v737_v51 = vperm.slane %v733_v35, 2 }
  0xb3   : > { %638 = vrot.lane.b32.xlu1 %v634_v41, %s1869_s20  ;;  %636 = vrot.lane.b32.xlu0 %v633_v42, %s1869_s20 }
  0xb4   : > { %640 = vrot.lane.b32.xlu2 %v635_v47, %s1869_s20  ;;  %s1877_s20 = smov 2  }
  0xb5   : > { %v281_v52 = vpop.permute.xlu1 %280  ;;  %v277_v53 = vpop.permute.xlu0 %276 }
  0xb6   : > { %v1997_v55 = vpop.permute.xlu2 %358 }
  0xbb   : > { %664 = vrot.lane.b32.xlu1 %v660_v56, %s1870_s22  ;;  %662 = vrot.lane.b32.xlu0 %v659_v57, %s1870_s22 }
  0xbc   : > { %666 = vrot.lane.b32.xlu2 %v661_v60, %s1870_s22  ;;  %s1878_s22 = smov 1  }
  0xbd   : > { %v303_v1 = vpop.permute.xlu1 %302  ;;  %v279_v2 = vpop.permute.xlu0 %278 }
  0xbe   : > { %v309_v6 = vsel %vm308_vm4, %v303_v1, %v1980_v22  ;;  %v283_v7 = vsel %vm282_vm5, %v277_v53, %v279_v2  ;;  %v284_v8 = vsel %vm282_vm5, %v279_v2, %v281_v52  ;;  %v2019_v10 = vpop.permute.xlu2 %382  ;;  %v759_v52 = vadd.f32 %v758_v44, %v756_v43 }
  0xbf   : > { %v313_v12 = vsel %vm253_vm7, %v309_v6, 0.0  ;;  %v287_v13 = vsel %vm251_vm8, %v283_v7, 0.0  ;;  %v288_v14 = vsel %vm252_vm9, %v284_v8, 0.0  ;;  %v781_v53 = vstv %s2048_s29  ;;  %s2170_s29 = sld [smem:[#allocation4 + $0x1d]] }
  0xc0   : > { %v315_v15 = vadd.f32 %v313_v12, %v287_v13  ;;  %v316_v16 = vadd.f32 %v314_v11, %v288_v14  ;;  %v762_v60 = vperm.slane %v759_v52, 1  ;;  %v761_v61 = vperm.slane %v759_v52, 0 }
  0xc1   : > { %v782_v2 = vmul.f32 %v781_v53, %v1948_v39  ;;  %v763_v6 = vperm.slane %v759_v52, 2  ;;  %v807_v8 = vstv %s2057_s3  ;;  %vm259_vm4 = vcmp.lt.s32.totalorder %v2001_v59, 14  ;;  %s2183_s3 = sld [smem:[#allocation4 + $0x1e]] }
  0xc2   : > { %v808_v14 = vmul.f32 %v807_v8, %v1948_v39  ;;  %vm436_vm5 = vcmask 367616   ;;  %v859_v43 = vstv %s2091_s11  ;;  %v861_v44 = vstv %s2093_s13  ;;  %s2213_s11 = sld [smem:[#allocation4 + $0x20]] }
  0xc3   : > { %690 = vrot.lane.b32.xlu1 %v686_v3, %s1871_s26  ;;  %688 = vrot.lane.b32.xlu0 %v685_v4, %s1871_s26  ;;  %v784_v3 = vmul.f32 %v783_v54, %v1951_v45  ;;  %s2215_s13 = sld [smem:[#allocation4 + $0x51]] }
  0xc4   : > { %692 = vrot.lane.b32.xlu2 %v687_v17, %s1871_s26  ;;  %s1879_s26 = smov 127  }
  0xc5   : > { %v331_v21 = vpop.permute.xlu1 %330  ;;  %v329_v22 = vpop.permute.xlu0 %328  ;;  %v785_v7 = vadd.f32 %v784_v3, %v782_v2 }
  0xc6   : > { %v336_v23 = vsel %vm334_vm10, %v331_v21, %v1986_v40  ;;  %v335_v24 = vsel %vm334_vm10, %v329_v22, %v331_v21  ;;  %v2038_v27 = vpop.permute.xlu2 %408  ;;  %vm262_vm10 = vcmp.lt.s32.totalorder %v1999_v58, 13 }
  0xc7   : > { %v340_v28 = vsel %vm2540_vm11, %v336_v23, 0.0  ;;  %v339_v29 = vsel %vm2541_vm12, %v335_v24, 0.0  ;;  %v788_v19 = vperm.slane %v785_v7, 1  ;;  %v787_v20 = vperm.slane %v785_v7, 0 }
  0xc8   : > { %v342_v32 = vadd.f32 %v340_v28, %v316_v16  ;;  %v341_v33 = vadd.f32 %v339_v29, %v315_v15  ;;  %v810_v15 = vmul.f32 %v809_v9, %v1951_v45  ;;  %v789_v23 = vperm.slane %v785_v7, 2 }
  0xca   : > { %v811_v24 = vadd.f32 %v810_v15, %v808_v14 }
  0xcb   : > { %716 = vrot.lane.b32.xlu1 %v712_v25, %s1872_s28  ;;  %714 = vrot.lane.b32.xlu0 %v711_v26, %s1872_s28  ;;  %v833_v25 = vstv %s2076_s7  ;;  %v835_v26 = vstv %s2080_s8  ;;  %s2200_s7 = sld [smem:[#allocation4 + $0x1f]] }
  0xcc   : > { %718 = vrot.lane.b32.xlu2 %v713_v34, %s1872_s28  ;;  %v814_v31 = vperm.slane %v811_v24, 1  ;;  %v834_v36 = vmul.f32 %v833_v25, %v1948_v39  ;;  %v836_v37 = vmul.f32 %v835_v26, %v1951_v45  ;;  %s1880_s28 = smov 126   ;;  %s2202_s8 = sld [smem:[#allocation4 + $0x50]] }
  0xcd   : > { %v357_v38 = vpop.permute.xlu1 %356  ;;  %v355_v40 = vpop.permute.xlu0 %354 }
  0xce   : > { %v362_v41 = vsel %vm360_vm13, %v357_v38, %v1997_v55  ;;  %v361_v42 = vsel %vm360_vm13, %v355_v40, %v357_v38  ;;  %v2055_v46 = vpop.permute.xlu2 %434  ;;  %vm261_vm13 = vcmp.lt.s32.totalorder %v2001_v59, 13 }
  0xcf   : > { %v366_v47 = vadd.f32 %v362_v41, %v342_v32  ;;  %v365_v48 = vadd.f32 %v361_v42, %v341_v33  ;;  %v813_v32 = vperm.slane %v811_v24, 0  ;;  %v815_v41 = vperm.slane %v811_v24, 2 }
  0xd0   : > { %v837_v42 = vadd.f32 %v836_v37, %v834_v36 }
  0xd3   : > { %740 = vrot.lane.b32.xlu1 %v736_v49, %s1873_s4  ;;  %738 = vrot.lane.b32.xlu0 %v735_v50, %s1873_s4  ;;  %v860_v50 = vmul.f32 %v859_v43, %v1948_v39  ;;  %v2127_v39 = vld [vmem:[#allocation2 + $0x1] sm:$0x7] }
  0xd4   : > { %742 = vrot.lane.b32.xlu2 %v737_v51, %s1873_s4  ;;  %v862_v51 = vmul.f32 %v861_v44, %v1951_v45  ;;  %v902_v45 = vstv %s2110_s16  ;;  %s1881_s4 = smov 125   ;;  %s2230_s16 = sld [smem:[#allocation4 + $0x21]] }
  0xd5   : > { %v381_v0 = vpop.permute.xlu1 %380  ;;  %v379_v55 = vpop.permute.xlu0 %378 }
  0xd6   : > { %v386_v56 = vsel %vm384_vm14, %v381_v0, %v2019_v10  ;;  %v385_v57 = vsel %vm384_vm14, %v379_v55, %v381_v0  ;;  %v2066_v62 = vpop.permute.xlu2 %460  ;;  %vm462_vm14 = vcmask 285696   ;;  %v840_v0 = vperm.slane %v837_v42, 1 }
  0xd7   : > { %v390_v63 = vsel %vm258_vm15, %v386_v56, 0.0  ;;  %v389_v1 = vsel %vm257_vm0, %v385_v57, 0.0  ;;  %v839_v55 = vperm.slane %v837_v42, 0 }
  0xd8   : > { %v392_v4 = vadd.f32 %v390_v63, %v366_v47  ;;  %v391_v5 = vadd.f32 %v389_v1, %v365_v48  ;;  %v905_v63 = vstv %s2112_s17  ;;  %s2232_s17 = sld [smem:[#allocation4 + $0x52]] }
  0xdb   : > { %766 = vrot.lane.b32.xlu1 %v762_v60, %s1874_s6  ;;  %764 = vrot.lane.b32.xlu0 %v761_v61, %s1874_s6  ;;  %v841_v60 = vperm.slane %v837_v42, 2  ;;  %v863_v61 = vadd.f32 %v862_v51, %v860_v50  ;;  %v981_v50 = vstv %s2157_s25  ;;  %v983_v51 = vstv %s2159_s27  ;;  %s2269_s25 = sld [smem:[#allocation4 + $0x24]] }
  0xdc   : > { %768 = vrot.lane.b32.xlu2 %v763_v6, %s1874_s6  ;;  %s1882_s6 = smov 115   ;;  %s2271_s27 = sld [smem:[#allocation4 + $0x55]] }
  0xdd   : > { %v407_v10 = vpop.permute.xlu1 %406  ;;  %v405_v11 = vpop.permute.xlu0 %404  ;;  %v865_v6 = vperm.slane %v863_v61, 0  ;;  %v867_v14 = vperm.slane %v863_v61, 2 }
  0xde   : > { %v412_v12 = vsel %vm410_vm2, %v407_v10, %v2038_v27  ;;  %v411_v13 = vsel %vm410_vm2, %v405_v11, %v407_v10  ;;  %v2085_v16 = vpop.permute.xlu2 %486  ;;  %vm488_vm2 = vcmask 277504   ;;  %v903_v10 = vmul.f32 %v902_v45, %v2127_v39 }
  0xdf   : > { %v416_v17 = vsel %vm260_vm3, %v412_v12, 0.0  ;;  %v415_v18 = vsel %vm259_vm4, %v411_v13, 0.0 }
  0xe0   : > { %v418_v21 = vadd.f32 %v416_v17, %v392_v4  ;;  %v417_v22 = vadd.f32 %v415_v18, %v391_v5  ;;  %v866_v5 = vperm.slane %v863_v61, 1  ;;  %v931_v17 = vstv %s2125_s21  ;;  %s2245_s21 = sld [smem:[#allocation4 + $0x53]] }
  0xe3   : > { %792 = vrot.lane.b32.xlu1 %v788_v19, %s1875_s12  ;;  %790 = vrot.lane.b32.xlu0 %v787_v20, %s1875_s12 }
  0xe4   : > { %794 = vrot.lane.b32.xlu2 %v789_v23, %s1875_s12  ;;  %s1883_s12 = smov 114  }
  0xe5   : > { %v433_v27 = vpop.permute.xlu1 %432  ;;  %v431_v28 = vpop.permute.xlu0 %430 }
  0xe6   : > { %v438_v29 = vsel %vm436_vm5, %v433_v27, %v2055_v46  ;;  %v437_v30 = vsel %vm436_vm5, %v431_v28, %v433_v27  ;;  %v2100_v33 = vpop.permute.xlu2 %512  ;;  %vm514_vm5 = vcmask 269312  }
  0xe7   : > { %v442_v34 = vsel %vm262_vm10, %v438_v29, 0.0  ;;  %v441_v35 = vsel %vm261_vm13, %v437_v30, 0.0 }
  0xe8   : > { %v444_v38 = vadd.f32 %v442_v34, %v418_v21  ;;  %v443_v40 = vadd.f32 %v441_v35, %v417_v22  ;;  %v957_v34 = vstv %s2146_s24  ;;  %s2262_s24 = sld [smem:[#allocation4 + $0x54]] }
  0xeb   : > { %818 = vrot.lane.b32.xlu1 %v814_v31, %s1876_s14  ;;  %816 = vrot.lane.b32.xlu0 %v813_v32, %s1876_s14 }
  0xec   : > { %820 = vrot.lane.b32.xlu2 %v815_v41, %s1876_s14  ;;  %s1884_s14 = smov 113  }
  0xed   : > { %v459_v46 = vpop.permute.xlu1 %458  ;;  %v457_v47 = vpop.permute.xlu0 %456 }
  0xee   : > { %v464_v48 = vsel %vm462_vm14, %v459_v46, %v2066_v62  ;;  %v463_v49 = vsel %vm462_vm14, %v457_v47, %v459_v46  ;;  %v2117_v52 = vpop.permute.xlu2 %538  ;;  %v2130_v62 = vld [vmem:[#allocation3 + $0x1] sm:$0x7]  ;;  %vm540_vm14 = vcmask 261120  }
  0xef   : > { %v468_v53 = vsel %vm252_vm9, %v464_v48, 0.0  ;;  %v467_v54 = vsel %vm251_vm8, %v463_v49, 0.0  ;;  %v906_v11 = vmul.f32 %v905_v63, %v2130_v62  ;;  %v932_v23 = vmul.f32 %v931_v17, %v2130_v62 }
  0xf0   : > { %v470_v56 = vadd.f32 %v468_v53, %v444_v38  ;;  %v469_v57 = vadd.f32 %v467_v54, %v443_v40  ;;  %v958_v47 = vmul.f32 %v957_v34, %v2130_v62 }
  0xf1   : > { %v907_v15 = vadd.f32 %v906_v11, %v903_v10 }
  0xf3   : > { %844 = vrot.lane.b32.xlu1 %v840_v0, %s1877_s20  ;;  %842 = vrot.lane.b32.xlu0 %v839_v55, %s1877_s20  ;;  %v910_v27 = vperm.slane %v907_v15, 1  ;;  %v909_v28 = vperm.slane %v907_v15, 0  ;;  %v911_v31 = vperm.slane %v907_v15, 2  ;;  %v982_v55 = vmul.f32 %v981_v50, %v2127_v39 }
  0xf4   : > { %846 = vrot.lane.b32.xlu2 %v841_v60, %s1877_s20  ;;  %s1885_s20 = smov 112  }
  0xf5   : > { %v485_v1 = vpop.permute.xlu1 %484  ;;  %v483_v2 = vpop.permute.xlu0 %482 }
  0xf6   : > { %v490_v3 = vsel %vm488_vm2, %v485_v1, %v2085_v16  ;;  %v489_v4 = vsel %vm488_vm2, %v483_v2, %v485_v1  ;;  %v2134_v7 = vpop.permute.xlu2 %562  ;;  %v929_v16 = vstv %s2123_s19  ;;  %vm564_vm2 = vcmask 252928   ;;  %s2243_s19 = sld [smem:[#allocation4 + $0x22]] }
  0xf7   : > { %v494_v8 = vsel %vm254_vm6, %v490_v3, 0.0  ;;  %v493_v9 = vsel %vm253_vm7, %v489_v4, 0.0  ;;  %v930_v22 = vmul.f32 %v929_v16, %v2127_v39 }
  0xf8   : > { %v496_v12 = vadd.f32 %v494_v8, %v470_v56  ;;  %v495_v13 = vadd.f32 %v493_v9, %v469_v57  ;;  %v984_v56 = vmul.f32 %v983_v51, %v2130_v62 }
  0xf9   : > { %v933_v32 = vadd.f32 %v932_v23, %v930_v22  ;;  %v1033_v22 = vstv %s2183_s3  ;;  %v1035_v23 = vstv %s2185_s5  ;;  %s2299_s3 = sld [smem:[#allocation4 + $0x26]]  ;;  %s1889_s5 = smov 99  }
  0xfa   : > { %v985_v4 = vadd.f32 %v984_v56, %v982_v55 }
  0xfb   : > { %870 = vrot.lane.b32.xlu1 %v866_v5, %s1878_s22  ;;  %868 = vrot.lane.b32.xlu0 %v865_v6, %s1878_s22  ;;  %v936_v40 = vperm.slane %v933_v32, 1  ;;  %v935_v41 = vperm.slane %v933_v32, 0  ;;  %v937_v48 = vperm.slane %v933_v32, 2  ;;  %v1007_v5 = vstv %s2170_s29  ;;  %s2286_s29 = sld [smem:[#allocation4 + $0x25]] }
  0xfc   : > { %872 = vrot.lane.b32.xlu2 %v867_v14, %s1878_s22  ;;  %v1009_v6 = vstv %s2172_s30  ;;  %v988_v11 = vperm.slane %v985_v4, 1  ;;  %v1008_v16 = vmul.f32 %v1007_v5, %v2127_v39  ;;  %s1886_s22 = smov 111   ;;  %s2288_s30 = sld [smem:[#allocation4 + $0x56]] }
  0xfd   : > { %v511_v18 = vpop.permute.xlu1 %510  ;;  %v509_v19 = vpop.permute.xlu0 %508  ;;  %v1010_v17 = vmul.f32 %v1009_v6, %v2130_v62 }
  0xfe   : > { %v516_v20 = vsel %vm514_vm5, %v511_v18, %v2100_v33  ;;  %v515_v21 = vsel %vm514_vm5, %v509_v19, %v511_v18  ;;  %v2151_v24 = vpop.permute.xlu2 %588  ;;  %v955_v33 = vstv %s2144_s23  ;;  %vm590_vm5 = vcmask 244736   ;;  %s2260_s23 = sld [smem:[#allocation4 + $0x23]] }
  0xff   : > { %v520_v25 = vsel %vm2540_vm11, %v516_v20, 0.0  ;;  %v519_v26 = vsel %vm2541_vm12, %v515_v21, 0.0  ;;  %v956_v46 = vmul.f32 %v955_v33, %v2127_v39  ;;  %v989_v20 = vperm.slane %v985_v4, 2 }
 0x100   : > { %v522_v29 = vadd.f32 %v520_v25, %v496_v12  ;;  %v521_v30 = vadd.f32 %v519_v26, %v495_v13  ;;  %v987_v12 = vperm.slane %v985_v4, 0  ;;  %v1011_v21 = vadd.f32 %v1010_v17, %v1008_v16 }
 0x101   : > { %v959_v49 = vadd.f32 %v958_v47, %v956_v46 }
 0x102   : > { %v1014_v33 = vperm.slane %v1011_v21, 1  ;;  %v1013_v34 = vperm.slane %v1011_v21, 0 }
 0x103   : > { %914 = vrot.lane.b32.xlu1 %v910_v27, %s1879_s26  ;;  %912 = vrot.lane.b32.xlu0 %v909_v28, %s1879_s26  ;;  %v962_v45 = vperm.slane %v959_v49, 1  ;;  %v961_v63 = vperm.slane %v959_v49, 0  ;;  %v963_v3 = vperm.slane %v959_v49, 2  ;;  %v1034_v28 = vmul.f32 %v1033_v22, %v2127_v39 }
 0x104   : > { %916 = vrot.lane.b32.xlu2 %v911_v31, %s1879_s26  ;;  %s1887_s26 = smov 110  }
 0x105   : > { %v537_v35 = vpop.permute.xlu1 %536  ;;  %v535_v36 = vpop.permute.xlu0 %534 }
 0x106   : > { %v542_v37 = vsel %vm540_vm14, %v537_v35, %v2117_v52  ;;  %v541_v38 = vsel %vm540_vm14, %v535_v36, %v537_v35  ;;  %v2164_v42 = vpop.permute.xlu2 %614  ;;  %vm616_vm14 = vcmask 236544  }
 0x107   : > { %v546_v43 = vadd.f32 %v542_v37, %v522_v29  ;;  %v545_v44 = vadd.f32 %v541_v38, %v521_v30  ;;  %v1036_v29 = vmul.f32 %v1035_v23, %v2130_v62  ;;  %v1015_v37 = vperm.slane %v1011_v21, 2 }
 0x109   : > { %v1037_v38 = vadd.f32 %v1036_v29, %v1034_v28 }
 0x10b   : > { %940 = vrot.lane.b32.xlu1 %v936_v40, %s1880_s28  ;;  %938 = vrot.lane.b32.xlu0 %v935_v41, %s1880_s28  ;;  %v1059_v40 = vstv %s2200_s7  ;;  %v1061_v41 = vstv %s2202_s8  ;;  %v1040_v47 = vperm.slane %v1037_v38, 1  ;;  %v1041_v55 = vperm.slane %v1037_v38, 2  ;;  %s2316_s7 = sld [smem:[#allocation4 + $0x27]] }
 0x10c   : > { %942 = vrot.lane.b32.xlu2 %v937_v48, %s1880_s28  ;;  %v1039_v48 = vperm.slane %v1037_v38, 0  ;;  %s1888_s28 = smov 109   ;;  %s2318_s8 = sld [smem:[#allocation4 + $0x58]] }
 0x10d   : > { %v561_v52 = vpop.permute.xlu1 %560  ;;  %v559_v53 = vpop.permute.xlu0 %558 }
 0x10e   : > { %v566_v54 = vsel %vm564_vm2, %v561_v52, %v2134_v7  ;;  %v565_v0 = vsel %vm564_vm2, %v559_v53, %v561_v52  ;;  %v2177_v57 = vpop.permute.xlu2 %640  ;;  %vm642_vm2 = vcmask 154624   ;;  %v1060_v52 = vmul.f32 %v1059_v40, %v2127_v39 }
 0x10f   : > { %v570_v60 = vsel %vm258_vm15, %v566_v54, 0.0  ;;  %v569_v61 = vsel %vm257_vm0, %v565_v0, 0.0  ;;  %v1062_v53 = vmul.f32 %v1061_v41, %v2130_v62 }
 0x110   : > { %v572_v1 = vadd.f32 %v570_v60, %v546_v43  ;;  %v571_v2 = vadd.f32 %v569_v61, %v545_v44  ;;  %v1085_v60 = vstv %s2215_s13  ;;  %s2333_s13 = sld [smem:[#allocation4 + $0x28]] }
 0x111   : > { %v1063_v56 = vadd.f32 %v1062_v53, %v1060_v52 }
 0x113   : > { %966 = vrot.lane.b32.xlu1 %v962_v45, %s1881_s4  ;;  %964 = vrot.lane.b32.xlu0 %v961_v63, %s1881_s4 }
 0x114   : > { %968 = vrot.lane.b32.xlu2 %v963_v3, %s1881_s4  ;;  %v1086_v3 = vmul.f32 %v1085_v60, %v2130_v62  ;;  %s2301_s4 = sld [smem:[#allocation4 + $0x57]] }
 0x115   : > { %v587_v7 = vpop.permute.xlu1 %586  ;;  %v585_v8 = vpop.permute.xlu0 %584 }
 0x116   : > { %v592_v9 = vsel %vm590_vm5, %v587_v7, %v2151_v24  ;;  %v591_v10 = vsel %vm590_vm5, %v585_v8, %v587_v7  ;;  %v2190_v13 = vpop.permute.xlu2 %666  ;;  %vm668_vm5 = vcmask 146432   ;;  %v1066_v7 = vperm.slane %v1063_v56, 1 }
 0x117   : > { %v596_v14 = vsel %vm260_vm3, %v592_v9, 0.0  ;;  %v595_v15 = vsel %vm259_vm4, %v591_v10, 0.0  ;;  %v1065_v8 = vperm.slane %v1063_v56, 0 }
 0x118   : > { %v598_v18 = vadd.f32 %v596_v14, %v572_v1  ;;  %v597_v19 = vadd.f32 %v595_v15, %v571_v2  ;;  %v1111_v14 = vstv %s2232_s17  ;;  %s1892_s17 = smov 96  }
 0x11b   : > { %992 = vrot.lane.b32.xlu1 %v988_v11, %s1882_s6  ;;  %990 = vrot.lane.b32.xlu0 %v987_v12, %s1882_s6  ;;  %v1067_v11 = vperm.slane %v1063_v56, 2 }
 0x11c   : > { %994 = vrot.lane.b32.xlu2 %v989_v20, %s1882_s6  ;;  %s1890_s6 = smov 98  }
 0x11d   : > { %v613_v24 = vpop.permute.xlu1 %612  ;;  %v611_v25 = vpop.permute.xlu0 %610 }
 0x11e   : > { %v618_v26 = vsel %vm616_vm14, %v613_v24, %v2164_v42  ;;  %v617_v27 = vsel %vm616_vm14, %v611_v25, %v613_v24  ;;  %v2207_v30 = vpop.permute.xlu2 %692  ;;  %vm694_vm14 = vcmask 138240   ;;  %v1112_v25 = vmul.f32 %v1111_v14, %v2130_v62 }
 0x11f   : > { %v622_v31 = vsel %vm262_vm10, %v618_v26, 0.0  ;;  %v621_v32 = vsel %vm261_vm13, %v617_v27, 0.0 }
 0x120   : > { %v624_v35 = vadd.f32 %v622_v31, %v598_v18  ;;  %v623_v36 = vadd.f32 %v621_v32, %v597_v19  ;;  %v1137_v31 = vstv %s2245_s21  ;;  %s2365_s21 = sld [smem:[#allocation4 + $0x2a]] }
 0x123   : > { %1018 = vrot.lane.b32.xlu1 %v1014_v33, %s1883_s12  ;;  %1016 = vrot.lane.b32.xlu0 %v1013_v34, %s1883_s12 }
 0x124   : > { %1020 = vrot.lane.b32.xlu2 %v1015_v37, %s1883_s12  ;;  %v1138_v37 = vmul.f32 %v1137_v31, %v2130_v62  ;;  %s2327_s12 = sld [smem:[#allocation4 + $0x49]] }
 0x125   : > { %v639_v42 = vpop.permute.xlu1 %638  ;;  %v637_v43 = vpop.permute.xlu0 %636 }
 0x126   : > { %v644_v44 = vsel %vm642_vm2, %v639_v42, %v2177_v57  ;;  %v643_v46 = vsel %vm642_vm2, %v637_v43, %v639_v42  ;;  %v2220_v49 = vpop.permute.xlu2 %718  ;;  %v1083_v57 = vstv %s2213_s11  ;;  %vm720_vm2 = vcmask 130048   ;;  %s2322_s11 = sld [smem:[#allocation4 + $0x18]] }
 0x127   : > { %v648_v50 = vsel %vm252_vm9, %v644_v44, 0.0  ;;  %v647_v51 = vsel %vm251_vm8, %v643_v46, 0.0  ;;  %v1084_v2 = vmul.f32 %v1083_v57, %v2127_v39 }
 0x128   : > { %v650_v54 = vadd.f32 %v648_v50, %v624_v35  ;;  %v649_v0 = vadd.f32 %v647_v51, %v623_v36 }
 0x129   : > { %v1087_v12 = vadd.f32 %v1086_v3, %v1084_v2  ;;  %v1187_v2 = vstv %s2269_s25  ;;  %v1189_v3 = vstv %s2271_s27  ;;  %s2382_s25 = sld [smem:[#allocation4 + $0x2b]] }
 0x12a   : > { %s2395_s27 = sld [smem:[#allocation4 + $0x2c]] }
 0x12b   : > { %1044 = vrot.lane.b32.xlu1 %v1040_v47, %s1884_s14  ;;  %1042 = vrot.lane.b32.xlu0 %v1039_v48, %s1884_s14  ;;  %v1090_v19 = vperm.slane %v1087_v12, 1  ;;  %v1089_v20 = vperm.slane %v1087_v12, 0  ;;  %v1091_v28 = vperm.slane %v1087_v12, 2  ;;  %v1161_v47 = vstv %s2260_s23  ;;  %s2367_s23 = sld [smem:[#allocation4 + $0x5b]] }
 0x12c   : > { %1046 = vrot.lane.b32.xlu2 %v1041_v55, %s1884_s14  ;;  %v1163_v48 = vstv %s2262_s24  ;;  %v1162_v57 = vmul.f32 %v1161_v47, %v2127_v39  ;;  %s2335_s14 = sld [smem:[#allocation4 + $0x59]]  ;;  %s1894_s24 = smov 94  }
 0x12d   : > { %v665_v61 = vpop.permute.xlu1 %664  ;;  %v663_v45 = vpop.permute.xlu0 %662  ;;  %v1164_v60 = vmul.f32 %v1163_v48, %v2130_v62 }
 0x12e   : > { %v670_v63 = vsel %vm668_vm5, %v665_v61, %v2190_v13  ;;  %v669_v1 = vsel %vm668_vm5, %v663_v45, %v665_v61  ;;  %v2237_v4 = vpop.permute.xlu2 %742  ;;  %v1109_v13 = vstv %s2230_s16  ;;  %vm744_vm5 = vcmask 121856   ;;  %s1891_s16 = smov 97  }
 0x12f   : > { %v674_v5 = vsel %vm254_vm6, %v670_v63, 0.0  ;;  %v673_v6 = vsel %vm253_vm7, %v669_v1, 0.0  ;;  %v1110_v24 = vmul.f32 %v1109_v13, %v2127_v39  ;;  %v1165_v1 = vadd.f32 %v1164_v60, %v1162_v57 }
 0x130   : > { %v676_v9 = vadd.f32 %v674_v5, %v650_v54  ;;  %v675_v10 = vadd.f32 %v673_v6, %v649_v0 }
 0x131   : > { %v1113_v29 = vadd.f32 %v1112_v25, %v1110_v24  ;;  %v1168_v13 = vperm.slane %v1165_v1, 1  ;;  %v1167_v14 = vperm.slane %v1165_v1, 0 }
 0x133   : > { %1070 = vrot.lane.b32.xlu1 %v1066_v7, %s1885_s20  ;;  %1068 = vrot.lane.b32.xlu0 %v1065_v8, %s1885_s20  ;;  %v1116_v42 = vperm.slane %v1113_v29, 1  ;;  %v1115_v43 = vperm.slane %v1113_v29, 0  ;;  %v1117_v44 = vperm.slane %v1113_v29, 2  ;;  %v1188_v8 = vmul.f32 %v1187_v2, %v2127_v39 }
 0x134   : > { %1072 = vrot.lane.b32.xlu2 %v1067_v11, %s1885_s20  ;;  %v889_v2 = vstv %s2327_s12  ;;  %s2354_s20 = sld [smem:[#allocation4 + $0x5a]] }
 0x135   : > { %v691_v15 = vpop.permute.xlu1 %690  ;;  %v689_v16 = vpop.permute.xlu0 %688  ;;  %s2443_s12 = sld [smem:[#allocation4 + $0x60]] }
 0x136   : > { %v696_v17 = vsel %vm694_vm14, %v691_v15, %v2207_v30  ;;  %v695_v18 = vsel %vm694_vm14, %v689_v16, %v691_v15  ;;  %v2250_v21 = vpop.permute.xlu2 %768  ;;  %v1135_v30 = vstv %s2243_s19  ;;  %vm770_vm14 = vcmask 113664   ;;  %s2352_s19 = sld [smem:[#allocation4 + $0x29]] }
 0x137   : > { %v700_v22 = vsel %vm2540_vm11, %v696_v17, 0.0  ;;  %v699_v23 = vsel %vm2541_vm12, %v695_v18, 0.0  ;;  %v1136_v36 = vmul.f32 %v1135_v30, %v2127_v39  ;;  %v1169_v17 = vperm.slane %v1165_v1, 2 }
 0x138   : > { %v702_v26 = vadd.f32 %v700_v22, %v676_v9  ;;  %v701_v27 = vadd.f32 %v699_v23, %v675_v10  ;;  %v1190_v9 = vmul.f32 %v1189_v3, %v2130_v62  ;;  %v886_v1 = vstv %s2322_s11  ;;  %s1898_s11 = smov 81  }
 0x139   : > { %v1139_v46 = vadd.f32 %v1138_v37, %v1136_v36  ;;  %v1241_v36 = vstv %s2301_s4  ;;  %s2414_s4 = sld [smem:[#allocation4 + $0x5e]] }
 0x13a   : > { %v1191_v18 = vadd.f32 %v1190_v9, %v1188_v8  ;;  %v885_v8 = vld [vmem:[#allocation2 + $0x1] sm:$0x3]  ;;  %v888_v9 = vld [vmem:[#allocation3 + $0x1] sm:$0x3] }
 0x13b   : > { %1094 = vrot.lane.b32.xlu1 %v1090_v19, %s1886_s22  ;;  %1092 = vrot.lane.b32.xlu0 %v1089_v20, %s1886_s22  ;;  %v1142_v53 = vperm.slane %v1139_v46, 1  ;;  %v1141_v54 = vperm.slane %v1139_v46, 0  ;;  %v1143_v63 = vperm.slane %v1139_v46, 2  ;;  %v1213_v19 = vstv %s2286_s29  ;;  %s1895_s29 = smov 93  }
 0x13c   : > { %1096 = vrot.lane.b32.xlu2 %v1091_v28, %s1886_s22  ;;  %v1215_v20 = vstv %s2288_s30  ;;  %v1194_v25 = vperm.slane %v1191_v18, 1  ;;  %v1214_v30 = vmul.f32 %v1213_v19, %v2127_v39  ;;  %s1893_s22 = smov 95   ;;  %s2412_s30 = sld [smem:[#allocation4 + $0x2d]] }
 0x13d   : > { %v717_v32 = vpop.permute.xlu1 %716  ;;  %v715_v33 = vpop.permute.xlu0 %714  ;;  %v1216_v31 = vmul.f32 %v1215_v20, %v2130_v62 }
 0x13e   : > { %v722_v34 = vsel %vm720_vm2, %v717_v32, %v2220_v49  ;;  %v721_v35 = vsel %vm720_vm2, %v715_v33, %v717_v32  ;;  %v2267_v38 = vpop.permute.xlu2 %794  ;;  %vm796_vm2 = vcmask 105472  }
 0x13f   : > { %v726_v40 = vadd.f32 %v722_v34, %v702_v26  ;;  %v725_v41 = vadd.f32 %v721_v35, %v701_v27  ;;  %v1193_v26 = vperm.slane %v1191_v18, 0  ;;  %v1195_v34 = vperm.slane %v1191_v18, 2 }
 0x140   : > { %v1239_v35 = vstv %s2299_s3  ;;  %v1217_v37 = vadd.f32 %v1216_v31, %v1214_v30  ;;  %s1896_s3 = smov 83  }
 0x143   : > { %1120 = vrot.lane.b32.xlu1 %v1116_v42, %s1887_s26  ;;  %1118 = vrot.lane.b32.xlu0 %v1115_v43, %s1887_s26  ;;  %v1242_v42 = vmul.f32 %v1241_v36, %v2130_v62  ;;  %v1315_v36 = vstv %s2352_s19  ;;  %s1901_s19 = smov 78  }
 0x144   : > { %1122 = vrot.lane.b32.xlu2 %v1117_v44, %s1887_s26  ;;  %s2384_s26 = sld [smem:[#allocation4 + $0x5c]] }
 0x145   : > { %v741_v49 = vpop.permute.xlu1 %740  ;;  %v739_v50 = vpop.permute.xlu0 %738 }
 0x146   : > { %v746_v51 = vsel %vm744_vm5, %v741_v49, %v2237_v4  ;;  %v745_v52 = vsel %vm744_vm5, %v739_v50, %v741_v49  ;;  %v2276_v0 = vpop.permute.xlu2 %820  ;;  %vm822_vm5 = vcmask 23552   ;;  %v1220_v49 = vperm.slane %v1217_v37, 1 }
 0x147   : > { %v750_v55 = vsel %vm258_vm15, %v746_v51, 0.0  ;;  %v749_v56 = vsel %vm257_vm0, %v745_v52, 0.0  ;;  %v1219_v50 = vperm.slane %v1217_v37, 0 }
 0x148   : > { %v752_v61 = vadd.f32 %v750_v55, %v726_v40  ;;  %v751_v45 = vadd.f32 %v749_v56, %v725_v41  ;;  %v1240_v41 = vmul.f32 %v1239_v35, %v2127_v39  ;;  %v1265_v55 = vstv %s2318_s8  ;;  %s2441_s8 = sld [smem:[#allocation4 + $0x2f]] }
 0x14b   : > { %1146 = vrot.lane.b32.xlu1 %v1142_v53, %s1888_s28  ;;  %1144 = vrot.lane.b32.xlu0 %v1141_v54, %s1888_s28  ;;  %v1221_v53 = vperm.slane %v1217_v37, 2  ;;  %v1243_v54 = vadd.f32 %v1242_v42, %v1240_v41  ;;  %v1317_v37 = vstv %s2354_s20  ;;  %s1902_s20 = smov 77  }
 0x14c   : > { %1148 = vrot.lane.b32.xlu2 %v1143_v63, %s1888_s28  ;;  %s2397_s28 = sld [smem:[#allocation4 + $0x5d]] }
 0x14d   : > { %v767_v4 = vpop.permute.xlu1 %766  ;;  %v765_v5 = vpop.permute.xlu0 %764  ;;  %v1246_v60 = vperm.slane %v1243_v54, 1 }
 0x14e   : > { %v772_v6 = vsel %vm770_vm14, %v767_v4, %v2250_v21  ;;  %v771_v7 = vsel %vm770_vm14, %v765_v5, %v767_v4  ;;  %v2293_v10 = vpop.permute.xlu2 %846  ;;  %vm848_vm14 = vcmask 15360  }
 0x14f   : > { %v776_v11 = vsel %vm260_vm3, %v772_v6, 0.0  ;;  %v775_v12 = vsel %vm259_vm4, %v771_v7, 0.0  ;;  %v1266_v7 = vmul.f32 %v1265_v55, %v2130_v62 }
 0x150   : > { %v778_v15 = vadd.f32 %v776_v11, %v752_v61  ;;  %v777_v16 = vadd.f32 %v775_v12, %v751_v45  ;;  %v1245_v61 = vperm.slane %v1243_v54, 0  ;;  %v1247_v12 = vperm.slane %v1243_v54, 2 }
 0x153   : > { %1172 = vrot.lane.b32.xlu1 %v1168_v13, %s1889_s5  ;;  %1170 = vrot.lane.b32.xlu0 %v1167_v14, %s1889_s5  ;;  %v887_v13 = vmul.f32 %v886_v1, %v885_v8  ;;  %v890_v14 = vmul.f32 %v889_v2, %v888_v9 }
 0x154   : > { %1174 = vrot.lane.b32.xlu2 %v1169_v17, %s1889_s5  ;;  %s2421_s5 = sld [smem:[#allocation4 + $0x2e]] }
 0x155   : > { %v793_v21 = vpop.permute.xlu1 %792  ;;  %v791_v22 = vpop.permute.xlu0 %790 }
 0x156   : > { %v798_v23 = vsel %vm796_vm2, %v793_v21, %v2267_v38  ;;  %v797_v24 = vsel %vm796_vm2, %v791_v22, %v793_v21  ;;  %v2306_v27 = vpop.permute.xlu2 %872  ;;  %vm874_vm2 = vcmask 7168  }
 0x157   : > { %v802_v28 = vsel %vm262_vm10, %v798_v23, 0.0  ;;  %v801_v29 = vsel %vm261_vm13, %v797_v24, 0.0  ;;  %v891_v24 = vadd.f32 %v890_v14, %v887_v13  ;;  %v1369_v13 = vstv %s2384_s26 }
 0x158   : > { %v804_v32 = vadd.f32 %v802_v28, %v778_v15  ;;  %v803_v33 = vadd.f32 %v801_v29, %v777_v16  ;;  %v1289_v15 = vstv %s2333_s13  ;;  %v1291_v16 = vstv %s2335_s14  ;;  %s1899_s13 = smov 80   ;;  %s2452_s14 = sld [smem:[#allocation4 + $0x30]] }
 0x159   : > { %v1290_v20 = vmul.f32 %v1289_v15, %v2127_v39  ;;  %v1292_v21 = vmul.f32 %v1291_v16, %v2130_v62  ;;  %v894_v35 = vperm.slane %v891_v24, 1 }
 0x15b   : > { %1198 = vrot.lane.b32.xlu1 %v1194_v25, %s1890_s6  ;;  %1196 = vrot.lane.b32.xlu0 %v1193_v26, %s1890_s6 }
 0x15c   : > { %1200 = vrot.lane.b32.xlu2 %v1195_v34, %s1890_s6  ;;  %v1293_v34 = vadd.f32 %v1292_v21, %v1290_v20  ;;  %s1737_s6 = sld [smem:[#allocation4 + $0x5f]] }
 0x15d   : > { %v819_v38 = vpop.permute.xlu1 %818  ;;  %v817_v40 = vpop.permute.xlu0 %816 }
 0x15e   : > { %v824_v43 = vsel %vm822_vm5, %v819_v38, %v2276_v0  ;;  %v823_v44 = vsel %vm822_vm5, %v817_v40, %v819_v38  ;;  %v2325_v46 = vpop.permute.xlu2 %916  ;;  %v1263_v0 = vstv %s2316_s7  ;;  %vm918_vm5 = vcmask 1039360   ;;  %s1897_s7 = smov 82  }
 0x15f   : > { %v828_v47 = vsel %vm252_vm9, %v824_v43, 0.0  ;;  %v827_v48 = vsel %vm251_vm8, %v823_v44, 0.0  ;;  %v1264_v6 = vmul.f32 %v1263_v0, %v2127_v39  ;;  %v1297_v41 = vperm.slane %v1293_v34, 2 }
 0x160   : > { %v830_v51 = vadd.f32 %v828_v47, %v804_v32  ;;  %v829_v52 = vadd.f32 %v827_v48, %v803_v33  ;;  %v1296_v42 = vperm.slane %v1293_v34, 1  ;;  %v1295_v55 = vperm.slane %v1293_v34, 0 }
 0x161   : > { %v1267_v17 = vadd.f32 %v1266_v7, %v1264_v6 }
 0x163   : > { %1224 = vrot.lane.b32.xlu1 %v1220_v49, %s1891_s16  ;;  %1222 = vrot.lane.b32.xlu0 %v1219_v50, %s1891_s16  ;;  %v1271_v29 = vperm.slane %v1267_v17, 2  ;;  %v1270_v30 = vperm.slane %v1267_v17, 1  ;;  %v1269_v33 = vperm.slane %v1267_v17, 0 }
 0x164   : > { %1226 = vrot.lane.b32.xlu2 %v1221_v53, %s1891_s16  ;;  %v1318_v53 = vmul.f32 %v1317_v37, %v2130_v62  ;;  %s1900_s16 = smov 79  }
 0x165   : > { %v845_v56 = vpop.permute.xlu1 %844  ;;  %v843_v57 = vpop.permute.xlu0 %842 }
 0x166   : > { %v850_v45 = vsel %vm848_vm14, %v845_v56, %v2293_v10  ;;  %v849_v63 = vsel %vm848_vm14, %v843_v57, %v845_v56  ;;  %v2342_v3 = vpop.permute.xlu2 %942  ;;  %vm944_vm14 = vcmask 1031168   ;;  %v1341_v56 = vstv %s2365_s21 }
 0x167   : > { %v854_v4 = vsel %vm254_vm6, %v850_v45, 0.0  ;;  %v853_v5 = vsel %vm253_vm7, %v849_v63, 0.0  ;;  %v1343_v57 = vstv %s2367_s23  ;;  %v1342_v1 = vmul.f32 %v1341_v56, %v2127_v39  ;;  %s157_s23 = scalar_lea.vmem %s2538_s2, %s1746_s15 }
 0x168   : > { %v856_v10 = vadd.f32 %v854_v4, %v830_v51  ;;  %v855_v11 = vadd.f32 %v853_v5, %v829_v52  ;;  %v1316_v52 = vmul.f32 %v1315_v36, %v2127_v39  ;;  %v1344_v2 = vmul.f32 %v1343_v57, %v2130_v62 }
 0x16b   : > { %1250 = vrot.lane.b32.xlu1 %v1246_v60, %s1892_s17  ;;  %1248 = vrot.lane.b32.xlu0 %v1245_v61, %s1892_s17 }
 0x16c   : > { %1252 = vrot.lane.b32.xlu2 %v1247_v12, %s1892_s17  ;;  %v1367_v12 = vstv %s2382_s25  ;;  %s2454_s17 = sld [smem:[#allocation4 + $0x61]] }
 0x16d   : > { %v871_v18 = vpop.permute.xlu1 %870  ;;  %v869_v19 = vpop.permute.xlu0 %868 }
 0x16e   : > { %v876_v22 = vsel %vm874_vm2, %v871_v18, %v2306_v27  ;;  %v875_v23 = vsel %vm874_vm2, %v869_v19, %v871_v18  ;;  %v2359_v25 = vpop.permute.xlu2 %968  ;;  %v893_v27 = vperm.slane %v891_v24, 0  ;;  %vm970_vm2 = vcmask 1022976  }
 0x16f   : > { %v880_v26 = vsel %vm2540_vm11, %v876_v22, 0.0  ;;  %v879_v28 = vsel %vm2541_vm12, %v875_v23, 0.0  ;;  %v1368_v23 = vmul.f32 %v1367_v12, %v2127_v39  ;;  %v1370_v24 = vmul.f32 %v1369_v13, %v2130_v62 }
 0x170   : > { %v882_v31 = vadd.f32 %v880_v26, %v856_v10  ;;  %v881_v32 = vadd.f32 %v879_v28, %v855_v11  ;;  %v1345_v11 = vadd.f32 %v1344_v2, %v1342_v1 }
 0x172   : > { %v898_v43 = vadd.f32 %v894_v35, %v882_v31  ;;  %v897_v47 = vadd.f32 %v893_v27, %v881_v32  ;;  %v1349_v18 = vperm.slane %v1345_v11, 2  ;;  %v1348_v19 = vperm.slane %v1345_v11, 1 }
 0x173   : > { %1276 = vrot.lane.b32.xlu1 %v1271_v29, %s1893_s22  ;;  %1274 = vrot.lane.b32.xlu0 %v1270_v30, %s1893_s22  ;;  %v1347_v29 = vperm.slane %v1345_v11, 0  ;;  %v1393_v30 = vstv %s2395_s27  ;;  %v1371_v31 = vadd.f32 %v1370_v24, %v1368_v23  ;;  %v1824_v24 = vld [vmem:[#allocation2 + $0x1] sm:$0x7] }
 0x174   : > { %1272 = vrot.lane.b32.xlu2 %v1269_v33, %s1893_s22  ;;  %v1394_v34 = vmul.f32 %v1393_v30, %v2127_v39 }
 0x175   : > { %v915_v38 = vpop.permute.xlu1 %914  ;;  %v913_v40 = vpop.permute.xlu0 %912 }
 0x176   : > { %v920_v44 = vsel %vm918_vm5, %v915_v38, %v2325_v46  ;;  %v919_v48 = vsel %vm918_vm5, %v913_v40, %v915_v38  ;;  %v2372_v49 = vpop.permute.xlu2 %994  ;;  %v1319_v46 = vadd.f32 %v1318_v53, %v1316_v52  ;;  %vm996_vm5 = vcmask 941056  }
 0x177   : > { %v924_v50 = vsel %vm258_vm15, %v920_v44, 0.0  ;;  %v923_v51 = vsel %vm257_vm0, %v919_v48, 0.0 }
 0x178   : > { %v926_v54 = vadd.f32 %v924_v50, %v898_v43  ;;  %v925_v0 = vadd.f32 %v923_v51, %v897_v47  ;;  %v1323_v7 = vperm.slane %v1319_v46, 2  ;;  %v1322_v8 = vperm.slane %v1319_v46, 1 }
 0x179   : > { %v1373_v47 = vperm.slane %v1371_v31, 0  ;;  %v1421_v50 = vstv %s2414_s4 }
 0x17a   : > { %v1422_v56 = vmul.f32 %v1421_v50, %v2130_v62 }
 0x17b   : > { %1302 = vrot.lane.b32.xlu1 %v1297_v41, %s1894_s24  ;;  %1300 = vrot.lane.b32.xlu0 %v1296_v42, %s1894_s24  ;;  %v1375_v41 = vperm.slane %v1371_v31, 2  ;;  %v1374_v42 = vperm.slane %v1371_v31, 1 }
 0x17c   : > { %1298 = vrot.lane.b32.xlu2 %v1295_v55, %s1894_s24 }
 0x17d   : > { %v941_v60 = vpop.permute.xlu1 %940  ;;  %v939_v61 = vpop.permute.xlu0 %938 }
 0x17e   : > { %v946_v45 = vsel %vm944_vm14, %v941_v60, %v2342_v3  ;;  %v945_v63 = vsel %vm944_vm14, %v939_v61, %v941_v60  ;;  %v2389_v4 = vpop.permute.xlu2 %1020  ;;  %v1321_v3 = vperm.slane %v1319_v46, 0  ;;  %vm1022_vm14 = vcmask 932864  }
 0x17f   : > { %v950_v5 = vsel %vm260_vm3, %v946_v45, 0.0  ;;  %v949_v6 = vsel %vm259_vm4, %v945_v63, 0.0  ;;  %v1443_v45 = vstv %s2421_s5  ;;  %v1445_v63 = vstv %s1737_s6 }
 0x180   : > { %v952_v9 = vadd.f32 %v950_v5, %v926_v54  ;;  %v951_v10 = vadd.f32 %v949_v6, %v925_v0  ;;  %v1446_v6 = vmul.f32 %v1445_v63, %v2130_v62 }
 0x183   : > { %1328 = vrot.lane.b32.xlu1 %v1323_v7, %s1895_s29  ;;  %1326 = vrot.lane.b32.xlu0 %v1322_v8, %s1895_s29 }
 0x184   : > { %1324 = vrot.lane.b32.xlu2 %v1321_v3, %s1895_s29 }
 0x185   : > { %v967_v14 = vpop.permute.xlu1 %966  ;;  %v965_v15 = vpop.permute.xlu0 %964 }
 0x186   : > { %v972_v16 = vsel %vm970_vm2, %v967_v14, %v2359_v25  ;;  %v971_v17 = vsel %vm970_vm2, %v965_v15, %v967_v14  ;;  %v2402_v20 = vpop.permute.xlu2 %1046  ;;  %v1395_v25 = vstv %s2397_s28  ;;  %vm1048_vm2 = vcmask 924672  }
 0x187   : > { %v976_v21 = vsel %vm262_vm10, %v972_v16, 0.0  ;;  %v975_v22 = vsel %vm261_vm13, %v971_v17, 0.0  ;;  %v1396_v35 = vmul.f32 %v1395_v25, %v2130_v62 }
 0x188   : > { %v978_v26 = vadd.f32 %v976_v21, %v952_v9  ;;  %v977_v28 = vadd.f32 %v975_v22, %v951_v10 }
 0x189   : > { %v1397_v48 = vadd.f32 %v1396_v35, %v1394_v34 }
 0x18b   : > { %1354 = vrot.lane.b32.xlu1 %v1349_v18, %s1896_s3  ;;  %1352 = vrot.lane.b32.xlu0 %v1348_v19, %s1896_s3  ;;  %v1401_v53 = vperm.slane %v1397_v48, 2  ;;  %v1400_v54 = vperm.slane %v1397_v48, 1  ;;  %v1399_v5 = vperm.slane %v1397_v48, 0  ;;  %v1469_v18 = vstv %s2441_s8 }
 0x18c   : > { %1350 = vrot.lane.b32.xlu2 %v1347_v29, %s1896_s3  ;;  %v1471_v19 = vstv %s2443_s12 }
 0x18d   : > { %v993_v32 = vpop.permute.xlu1 %992  ;;  %v991_v33 = vpop.permute.xlu0 %990 }
 0x18e   : > { %v998_v27 = vsel %vm996_vm5, %v993_v32, %v2372_v49  ;;  %v997_v36 = vsel %vm996_vm5, %v991_v33, %v993_v32  ;;  %v2419_v37 = vpop.permute.xlu2 %1072  ;;  %v1419_v49 = vstv %s2412_s30  ;;  %vm1074_vm5 = vcmask 916480  }
 0x18f   : > { %v1002_v38 = vsel %vm252_vm9, %v998_v27, 0.0  ;;  %v1001_v40 = vsel %vm251_vm8, %v997_v36, 0.0  ;;  %v1420_v46 = vmul.f32 %v1419_v49, %v2127_v39  ;;  %v1495_v27 = vstv %s2452_s14 }
 0x190   : > { %v1004_v43 = vadd.f32 %v1002_v38, %v978_v26  ;;  %v1003_v44 = vadd.f32 %v1001_v40, %v977_v28  ;;  %v1470_v26 = vmul.f32 %v1824_v24, %v1469_v18  ;;  %v1825_v28 = vld [vmem:[#allocation3 + $0x1] sm:$0x7]  ;;  %v1497_v36 = vstv %s2454_s17 }
 0x191   : > { %v1423_v7 = vadd.f32 %v1422_v56, %v1420_v46  ;;  %v1472_v29 = vmul.f32 %v1825_v28, %v1471_v19  ;;  %v1496_v49 = vmul.f32 %v1824_v24, %v1495_v27  ;;  %v1498_v50 = vmul.f32 %v1825_v28, %v1497_v36 }
 0x193   : > { %1380 = vrot.lane.b32.xlu1 %v1375_v41, %s1897_s7  ;;  %1378 = vrot.lane.b32.xlu0 %v1374_v42, %s1897_s7  ;;  %v1427_v13 = vperm.slane %v1423_v7, 2  ;;  %v1426_v14 = vperm.slane %v1423_v7, 1  ;;  %v1425_v32 = vperm.slane %v1423_v7, 0  ;;  %v1473_v35 = vadd.f32 %v1472_v29, %v1470_v26 }
 0x194   : > { %1376 = vrot.lane.b32.xlu2 %v1373_v47, %s1897_s7 }
 0x195   : > { %v1019_v51 = vpop.permute.xlu1 %1018  ;;  %v1017_v52 = vpop.permute.xlu0 %1016  ;;  %v1477_v42 = vperm.slane %v1473_v35, 2 }
 0x196   : > { %v1024_v0 = vsel %vm1022_vm14, %v1019_v51, %v2389_v4  ;;  %v1023_v55 = vsel %vm1022_vm14, %v1017_v52, %v1019_v51  ;;  %v2432_v57 = vpop.permute.xlu2 %1096  ;;  %v1444_v4 = vmul.f32 %v1443_v45, %v2127_v39  ;;  %vm1098_vm14 = vcmask 908288  }
 0x197   : > { %v1028_v60 = vsel %vm254_vm6, %v1024_v0, 0.0  ;;  %v1027_v61 = vsel %vm253_vm7, %v1023_v55, 0.0 }
 0x198   : > { %v1030_v1 = vadd.f32 %v1028_v60, %v1004_v43  ;;  %v1029_v2 = vadd.f32 %v1027_v61, %v1003_v44  ;;  %v1447_v39 = vadd.f32 %v1446_v6, %v1444_v4  ;;  %v1476_v43 = vperm.slane %v1473_v35, 1 }
 0x19a   : > { %v1450_v17 = vperm.slane %v1447_v39, 1  ;;  %v1451_v33 = vperm.slane %v1447_v39, 2  ;;  %v1449_v34 = vperm.slane %v1447_v39, 0 }
 0x19b   : > { %1406 = vrot.lane.b32.xlu1 %v1401_v53, %s1898_s11  ;;  %1404 = vrot.lane.b32.xlu0 %v1400_v54, %s1898_s11  ;;  %v1475_v53 = vperm.slane %v1473_v35, 0  ;;  %v1499_v54 = vadd.f32 %v1498_v50, %v1496_v49 }
 0x19c   : > { %1402 = vrot.lane.b32.xlu2 %v1399_v5, %s1898_s11 }
 0x19d   : > { %v1045_v8 = vpop.permute.xlu1 %1044  ;;  %v1043_v9 = vpop.permute.xlu0 %1042  ;;  %v1503_v45 = vperm.slane %v1499_v54, 2  ;;  %v1502_v63 = vperm.slane %v1499_v54, 1  ;;  %v1501_v5 = vperm.slane %v1499_v54, 0 }
 0x19e   : > { %v1050_v10 = vsel %vm1048_vm2, %v1045_v8, %v2402_v20  ;;  %v1049_v3 = vsel %vm1048_vm2, %v1043_v9, %v1045_v8  ;;  %v1123_v11 = vpop.permute.xlu2 %1122  ;;  %vm1124_vm2 = vcmask 900096  }
 0x19f   : > { %v1054_v62 = vsel %vm2540_vm11, %v1050_v10, 0.0  ;;  %v1053_v12 = vsel %vm2541_vm12, %v1049_v3, 0.0 }
 0x1a0   : > { %v1056_v15 = vadd.f32 %v1054_v62, %v1030_v1  ;;  %v1055_v16 = vadd.f32 %v1053_v12, %v1029_v2 }
 0x1a3   : > { %1432 = vrot.lane.b32.xlu1 %v1427_v13, %s1899_s13  ;;  %1430 = vrot.lane.b32.xlu0 %v1426_v14, %s1899_s13 }
 0x1a4   : > { %1454 = vrot.lane.b32.xlu2 %v1450_v17, %s1900_s16 }
 0x1a5   : > { %v1071_v20 = vpop.permute.xlu1 %1070  ;;  %v1069_v21 = vpop.permute.xlu0 %1068 }
 0x1a6   : > { %v1076_v22 = vsel %vm1074_vm5, %v1071_v20, %v2419_v37  ;;  %v1075_v23 = vsel %vm1074_vm5, %v1069_v21, %v1071_v20  ;;  %v1149_v30 = vpop.permute.xlu2 %1148  ;;  %vm1150_vm5 = vcmask 891904  }
 0x1a7   : > { %v1080_v25 = vadd.f32 %v1076_v22, %v1056_v15  ;;  %v1079_v31 = vadd.f32 %v1075_v23, %v1055_v16 }
 0x1ab   : > { %1428 = vrot.lane.b32.xlu1 %v1425_v32, %s1899_s13  ;;  %1456 = vrot.lane.b32.xlu0 %v1451_v33, %s1900_s16 }
 0x1ac   : > { %1452 = vrot.lane.b32.xlu2 %v1449_v34, %s1900_s16 }
 0x1ad   : > { %v1095_v37 = vpop.permute.xlu1 %1094  ;;  %v1093_v38 = vpop.permute.xlu0 %1092 }
 0x1ae   : > { %v1100_v40 = vsel %vm1098_vm14, %v1095_v37, %v2432_v57  ;;  %v1099_v41 = vsel %vm1098_vm14, %v1093_v38, %v1095_v37  ;;  %v1175_v44 = vpop.permute.xlu2 %1174  ;;  %vm1176_vm14 = vcmask 809984  }
 0x1af   : > { %v1104_v47 = vsel %vm258_vm15, %v1100_v40, 0.0  ;;  %v1103_v48 = vsel %vm257_vm0, %v1099_v41, 0.0 }
 0x1b0   : > { %v1106_v51 = vadd.f32 %v1104_v47, %v1080_v25  ;;  %v1105_v52 = vadd.f32 %v1103_v48, %v1079_v31 }
 0x1b3   : > { %1482 = vrot.lane.b32.xlu1 %v1477_v42, %s1901_s19  ;;  %1480 = vrot.lane.b32.xlu0 %v1476_v43, %s1901_s19 }
 0x1b4   : > { %1478 = vrot.lane.b32.xlu2 %v1475_v53, %s1901_s19 }
 0x1b5   : > { %v1121_v0 = vpop.permute.xlu1 %1120  ;;  %v1119_v55 = vpop.permute.xlu0 %1118 }
 0x1b6   : > { %v1126_v46 = vsel %vm1124_vm2, %v1121_v0, %v1123_v11  ;;  %v1125_v56 = vsel %vm1124_vm2, %v1119_v55, %v1121_v0  ;;  %v1201_v57 = vpop.permute.xlu2 %1200  ;;  %vm1202_vm2 = vcmask 801792  }
 0x1b7   : > { %v1130_v60 = vsel %vm260_vm3, %v1126_v46, 0.0  ;;  %v1129_v61 = vsel %vm259_vm4, %v1125_v56, 0.0 }
 0x1b8   : > { %v1132_v1 = vadd.f32 %v1130_v60, %v1106_v51  ;;  %v1131_v2 = vadd.f32 %v1129_v61, %v1105_v52 }
 0x1bb   : > { %1508 = vrot.lane.b32.xlu1 %v1503_v45, %s1902_s20  ;;  %1506 = vrot.lane.b32.xlu0 %v1502_v63, %s1902_s20 }
 0x1bc   : > { %1504 = vrot.lane.b32.xlu2 %v1501_v5, %s1902_s20 }
 0x1bd   : > { %v1147_v4 = vpop.permute.xlu1 %1146  ;;  %v1145_v6 = vpop.permute.xlu0 %1144 }
 0x1be   : > { %v1152_v7 = vsel %vm1150_vm5, %v1147_v4, %v1149_v30  ;;  %v1151_v8 = vsel %vm1150_vm5, %v1145_v6, %v1147_v4  ;;  %v1227_v9 = vpop.permute.xlu2 %1226  ;;  %vm1228_vm5 = vcmask 793600  }
 0x1bf   : > { %v1156_v10 = vsel %vm262_vm10, %v1152_v7, 0.0  ;;  %v1155_v3 = vsel %vm261_vm13, %v1151_v8, 0.0 }
 0x1c0   : > { %v1158_v39 = vadd.f32 %v1156_v10, %v1132_v1  ;;  %v1157_v11 = vadd.f32 %v1155_v3, %v1131_v2 }
 0x1c5   : > { %v1173_v62 = vpop.permute.xlu1 %1172  ;;  %v1171_v12 = vpop.permute.xlu0 %1170 }
 0x1c6   : > { %v1178_v13 = vsel %vm1176_vm14, %v1173_v62, %v1175_v44  ;;  %v1177_v14 = vsel %vm1176_vm14, %v1171_v12, %v1173_v62  ;;  %v1253_v19 = vpop.permute.xlu2 %1252  ;;  %vm1278_vm14 = vcmask 777216  }
 0x1c7   : > { %v1182_v15 = vsel %vm252_vm9, %v1178_v13, 0.0  ;;  %v1181_v16 = vsel %vm251_vm8, %v1177_v14, 0.0 }
 0x1c8   : > { %v1184_v17 = vadd.f32 %v1182_v15, %v1158_v39  ;;  %v1183_v18 = vadd.f32 %v1181_v16, %v1157_v11 }
 0x1cd   : > { %v1199_v20 = vpop.permute.xlu1 %1198  ;;  %v1197_v21 = vpop.permute.xlu0 %1196 }
 0x1ce   : > { %v1204_v22 = vsel %vm1202_vm2, %v1199_v20, %v1201_v57  ;;  %v1203_v23 = vsel %vm1202_vm2, %v1197_v21, %v1199_v20  ;;  %v1273_v30 = vpop.permute.xlu2 %1272  ;;  %vm1254_vm2 = vcmask 785408  }
 0x1cf   : > { %v1208_v24 = vsel %vm254_vm6, %v1204_v22, 0.0  ;;  %v1207_v26 = vsel %vm253_vm7, %v1203_v23, 0.0 }
 0x1d0   : > { %v1210_v28 = vadd.f32 %v1208_v24, %v1184_v17  ;;  %v1209_v29 = vadd.f32 %v1207_v26, %v1183_v18 }
 0x1d5   : > { %v1225_v25 = vpop.permute.xlu1 %1224  ;;  %v1223_v31 = vpop.permute.xlu0 %1222 }
 0x1d6   : > { %v1230_v32 = vsel %vm1228_vm5, %v1225_v25, %v1227_v9  ;;  %v1229_v33 = vsel %vm1228_vm5, %v1223_v31, %v1225_v25  ;;  %v1299_v37 = vpop.permute.xlu2 %1298  ;;  %vm1304_vm5 = vcmask 769024  }
 0x1d7   : > { %v1234_v34 = vsel %vm2540_vm11, %v1230_v32, 0.0  ;;  %v1233_v35 = vsel %vm2541_vm12, %v1229_v33, 0.0  ;;  %vm1356_vm11 = vcmask 678912   ;;  %vm1382_vm12 = vcmask 670720  }
 0x1d8   : > { %v1236_v27 = vadd.f32 %v1234_v34, %v1210_v28  ;;  %v1235_v36 = vadd.f32 %v1233_v35, %v1209_v29 }
 0x1dd   : > { %v1251_v38 = vpop.permute.xlu1 %1250  ;;  %v1249_v40 = vpop.permute.xlu0 %1248 }
 0x1de   : > { %v1325_v43 = vpop.permute.xlu2 %1324  ;;  %v1255_v63 = vsel %vm1254_vm2, %v1249_v40, %v1251_v38  ;;  %v1256_v5 = vsel %vm1254_vm2, %v1251_v38, %v1253_v19 }
 0x1df   : > { %v1259_v7 = vadd.f32 %v1255_v63, %v1235_v36  ;;  %v1260_v39 = vadd.f32 %v1256_v5, %v1236_v27 }
 0x1e5   : > { %v1277_v41 = vpop.permute.xlu1 %1276  ;;  %v1275_v42 = vpop.permute.xlu0 %1274 }
 0x1e6   : > { %v1351_v48 = vpop.permute.xlu2 %1350  ;;  %v1279_v45 = vsel %vm1278_vm14, %v1273_v30, %v1275_v42  ;;  %v1280_v1 = vsel %vm1278_vm14, %v1275_v42, %v1277_v41  ;;  %vm1408_vm14 = vcmask 662528  }
 0x1e7   : > { %v1283_v4 = vsel %vm257_vm0, %v1279_v45, 0.0  ;;  %v1284_v10 = vsel %vm258_vm15, %v1280_v1, 0.0 }
 0x1e8   : > { %v1285_v11 = vadd.f32 %v1283_v4, %v1259_v7  ;;  %v1286_v17 = vadd.f32 %v1284_v10, %v1260_v39 }
 0x1ed   : > { %v1303_v44 = vpop.permute.xlu1 %1302  ;;  %v1301_v47 = vpop.permute.xlu0 %1300 }
 0x1ee   : > { %v1377_v51 = vpop.permute.xlu2 %1376  ;;  %v1305_v2 = vsel %vm1304_vm5, %v1299_v37, %v1301_v47  ;;  %v1306_v8 = vsel %vm1304_vm5, %v1301_v47, %v1303_v44  ;;  %vm2544_vm5 = vcmask 1043456  }
 0x1ef   : > { %v1309_v3 = vsel %vm259_vm4, %v1305_v2, 0.0  ;;  %v1310_v13 = vsel %vm260_vm3, %v1306_v8, 0.0 }
 0x1f0   : > { %v1311_v18 = vadd.f32 %v1309_v3, %v1285_v11  ;;  %v1312_v23 = vadd.f32 %v1310_v13, %v1286_v17 }
 0x1f5   : > { %v1329_v49 = vpop.permute.xlu1 %1328  ;;  %v1327_v50 = vpop.permute.xlu0 %1326 }
 0x1f6   : > { %v1403_v54 = vpop.permute.xlu2 %1402  ;;  %v1331_v9 = vsel %vm1330_vm1, %v1325_v43, %v1327_v50  ;;  %v1332_v62 = vsel %vm1330_vm1, %v1327_v50, %v1329_v49  ;;  %vm2542_vm1 = vcmp.ge.s32.totalorder %v2001_v59, 1 }
 0x1f7   : > { %v1335_v14 = vsel %vm261_vm13, %v1331_v9, 0.0  ;;  %v1336_v21 = vsel %vm262_vm10, %v1332_v62, 0.0 }
 0x1f8   : > { %v1337_v24 = vadd.f32 %v1335_v14, %v1311_v18  ;;  %v1338_v31 = vadd.f32 %v1336_v21, %v1312_v23 }
 0x1fd   : > { %v1355_v52 = vpop.permute.xlu1 %1354  ;;  %v1353_v53 = vpop.permute.xlu0 %1352 }
 0x1fe   : > { %v1455_v57 = vpop.permute.xlu2 %1454  ;;  %v1357_v12 = vsel %vm1356_vm11, %v1351_v48, %v1353_v53  ;;  %v1358_v19 = vsel %vm1356_vm11, %v1353_v53, %v1355_v52  ;;  %vm1458_vm11 = vcmask 646144  }
 0x1ff   : > { %v1361_v22 = vsel %vm251_vm8, %v1357_v12, 0.0  ;;  %v1362_v29 = vsel %vm252_vm9, %v1358_v19, 0.0  ;;  %vm1434_vm8 = vcmask 654336   ;;  %vm2543_vm9 = vcmp.ge.s32.totalorder %v1999_v58, 1 }
 0x200   : > { %v1363_v32 = vadd.f32 %v1361_v22, %v1337_v24  ;;  %v1364_v27 = vadd.f32 %v1362_v29, %v1338_v31 }
 0x205   : > { %v1381_v0 = vpop.permute.xlu1 %1380  ;;  %v1379_v55 = vpop.permute.xlu0 %1378 }
 0x206   : > { %v1453_v6 = vpop.permute.xlu2 %1452  ;;  %v1383_v20 = vsel %vm1382_vm12, %v1377_v51, %v1379_v55  ;;  %v1384_v26 = vsel %vm1382_vm12, %v1379_v55, %v1381_v0 }
 0x207   : > { %v1387_v30 = vsel %vm253_vm7, %v1383_v20, 0.0  ;;  %v1388_v34 = vsel %vm254_vm6, %v1384_v26, 0.0  ;;  %vm1484_vm7 = vcmask 637952   ;;  %v1459_v48 = vsel %vm1458_vm11, %v1453_v6, %v1455_v57 }
 0x208   : > { %v1389_v36 = vadd.f32 %v1387_v30, %v1363_v32  ;;  %v1390_v42 = vadd.f32 %v1388_v34, %v1364_v27  ;;  %v1463_v0 = vsel %vm257_vm0, %v1459_v48, 0.0  ;;  %vm1510_vm6 = vcmask 629760   ;;  %v1557_v32 = vld [vmem:[%s1938_s18] sm:$0xff] }
 0x20d   : > { %v1407_v46 = vpop.permute.xlu1 %1406  ;;  %v1405_v56 = vpop.permute.xlu0 %1404 }
 0x20e   : > { %v1409_v28 = vsel %vm1408_vm14, %v1403_v54, %v1405_v56  ;;  %v1479_v25 = vpop.permute.xlu2 %1478  ;;  %v1410_v33 = vsel %vm1408_vm14, %v1405_v56, %v1407_v46 }
 0x20f   : > { %v1413_v35 = vsel %vm2542_vm1, %v1409_v28, 0.0  ;;  %v1414_v37 = vsel %vm2543_vm9, %v1410_v33, 0.0 }
 0x210   : > { %v1415_v43 = vadd.f32 %v1413_v35, %v1389_v36  ;;  %v1416_v49 = vadd.f32 %v1414_v37, %v1390_v42 }
 0x215   : > { %v1433_v60 = vpop.permute.xlu1 %1432  ;;  %v1431_v61 = vpop.permute.xlu0 %1430 }
 0x216   : > { %v1436_v47 = vsel %vm1434_vm8, %v1431_v61, %v1433_v60  ;;  %v1505_v56 = vpop.permute.xlu2 %1504 }
 0x217   : > { %v1440_v54 = vadd.f32 %v1436_v47, %v1416_v49 }
 0x21d   : > { %v1429_v15 = vpop.permute.xlu1 %1428  ;;  %v1457_v16 = vpop.permute.xlu0 %1456 }
 0x21e   : > { %v1435_v38 = vsel %vm1434_vm8, %v1429_v15, %v1431_v61  ;;  %v1460_v44 = vsel %vm1458_vm11, %v1455_v57, %v1457_v16 }
 0x21f   : > { %v1439_v50 = vadd.f32 %v1435_v38, %v1415_v43  ;;  %v1464_v53 = vsel %vm258_vm15, %v1460_v44, 0.0 }
 0x220   : > { %v1466_v60 = vadd.f32 %v1464_v53, %v1440_v54 }
 0x221   : > { %v1465_v57 = vadd.f32 %v1463_v0, %v1439_v50 }
 0x225   : > { %v1483_v40 = vpop.permute.xlu1 %1482  ;;  %v1481_v41 = vpop.permute.xlu0 %1480 }
 0x226   : > { %v1485_v51 = vsel %vm1484_vm7, %v1479_v25, %v1481_v41  ;;  %v1486_v52 = vsel %vm1484_vm7, %v1481_v41, %v1483_v40 }
 0x227   : > { %v1489_v55 = vsel %vm259_vm4, %v1485_v51, 0.0  ;;  %v1490_v46 = vsel %vm260_vm3, %v1486_v52, 0.0 }
 0x228   : > { %v1491_v63 = vadd.f32 %v1489_v55, %v1465_v57  ;;  %v1492_v1 = vadd.f32 %v1490_v46, %v1466_v60 }
 0x22d   : > { %v1509_v61 = vpop.permute.xlu1 %1508  ;;  %v1507_v45 = vpop.permute.xlu0 %1506 }
 0x22e   : > { %v1511_v2 = vsel %vm1510_vm6, %v1505_v56, %v1507_v45  ;;  %v1512_v5 = vsel %vm1510_vm6, %v1507_v45, %v1509_v61 }
 0x22f   : > { %v1515_v4 = vsel %vm261_vm13, %v1511_v2, 0.0  ;;  %v1516_v6 = vsel %vm262_vm10, %v1512_v5, 0.0 }
 0x230   : > { %v1517_v7 = vadd.f32 %v1515_v4, %v1491_v63  ;;  %v1518_v8 = vadd.f32 %v1516_v6, %v1492_v1 }
 0x232   : > { %v1742_v9 = vmul.f32 -1.442695, %v1517_v7  ;;  %v1743_v10 = vmul.f32 -1.442695, %v1518_v8 }
 0x234   : > { %1816 = vpow2.f32 %v1742_v9 }
 0x235   : > { %1818 = vpow2.f32 %v1743_v10 }
 0x23a   : > { %v1817_v3 = vpop.eup %1816 }
 0x23b   : > { %v1819_v39 = vpop.eup %1818  ;;  %v1525_v11 = vadd.f32 1.0, %v1817_v3 }
 0x23c   : > { %v1526_v62 = vadd.f32 1.0, %v1819_v39 }
 0x23d   : > { %1820 = vrcp.f32 %v1525_v11  ;;  %v1538_v17 = vand.u32 2147483648, %v1525_v11  ;;  %v1536_v19 = vand.u32 2147483647, %v1525_v11  ;;  %vm1532_vm0 = vweird.f32 %v1525_v11 }
 0x23e   : > { %1822 = vrcp.f32 %v1526_v62  ;;  %v1553_v18 = vand.u32 2147483648, %v1526_v62  ;;  %v1551_v21 = vand.u32 2147483647, %v1526_v62  ;;  %vm1547_vm4 = vweird.f32 %v1526_v62 }
 0x23f   : > { %v1539_v26 = vor.u32 1.1754944e-38, %v1538_v17  ;;  %vm1537_vm13 = vcmp.eq.f32.partialorder %v1536_v19, 8.507059e+37 }
 0x240   : > { %v1554_v28 = vor.u32 1.1754944e-38, %v1553_v18  ;;  %vm1552_vm2 = vcmp.eq.f32.partialorder %v1551_v21, 8.507059e+37 }
 0x243   : > { %v1821_v12 = vpop.eup %1820 }
 0x244   : > { %v1823_v13 = vpop.eup %1822  ;;  %v1528_v14 = vmul.f32 %v1821_v12, %v1525_v11  ;;  %vm1533_vm12 = vweird.f32 %v1821_v12 }
 0x245   : > { %v1543_v59 = vmul.f32 %v1823_v13, %v1526_v62  ;;  %vm1548_vm15 = vweird.f32 %v1823_v13  ;;  %vm1534_vm3 = vmor %vm1532_vm0, %vm1533_vm12 }
 0x246   : > { %v1529_v15 = vsub.f32 1.0, %v1528_v14  ;;  %vm1549_vm10 = vmor %vm1547_vm4, %vm1548_vm15 }
 0x247   : > { %v1544_v16 = vsub.f32 1.0, %v1543_v59 }
 0x248   : > { %v1530_v58 = vmul.f32 %v1821_v12, %v1529_v15 }
 0x249   : > { %v1545_v20 = vmul.f32 %v1823_v13, %v1544_v16 }
 0x24a   : > { %v1531_v22 = vadd.f32 %v1821_v12, %v1530_v58 }
 0x24b   : > { %v1546_v23 = vadd.f32 %v1823_v13, %v1545_v20 }
 0x24c   : > { %v1535_v24 = vsel %vm1534_vm3, %v1821_v12, %v1531_v22 }
 0x24d   : > { %v1550_v29 = vsel %vm1549_vm10, %v1823_v13, %v1546_v23  ;;  %v1540_v30 = vsel %vm1537_vm13, %v1539_v26, %v1535_v24 }
 0x24e   : > { %v1555_v25 = vsel %vm1552_vm2, %v1554_v28, %v1550_v29  ;;  %v1558_v33 = vperm.slane %v1540_v30, 0 }
 0x24f   : > { %v1559_v31 = vperm.slane %v1555_v25, 0 }
 0x251   : > { %v1562_v34 = vrot.slane %v1559_v31, 4 }
 0x253   : > { %v1563_v35 = vsel %vm2544_vm5, %v1558_v33, %v1562_v34 }
 0x254   : > { %v1565_v27 = vmul.f32 %v1563_v35, %v1557_v32 }
 0x256   : > { %1566 = vst [vmem:[%s157_s23] sm:$0xff] %v1565_v27 }
 0x257 PF: > { %s13_s9 = sadd.s32 1, %s1851_s9  }
 0x258   : > { %p10_p7 = scmp.ge.s32.totalorder %s13_s9, 4  }
 0x25a   :  { %12 = sbr.rel (!%p10_p7) target bundleno = 1 (0x1), region = 63 }
 0x25f   :  { %1588 = vsyncpa [#allocation5], 1 }
 0x260   :  { %1590 = vsyncpa [#allocation5 + $0x1], 1 }

</bundles_post_ra>
